<compile_context>
chip_gen: v7x
topology: tpu7x:2x2x1
jax: 0.10.0
libtpu: 0.0.40
codegen_flags: <defaults>
</compile_context>

<pallas_src>
import functools
import numpy as np
import jax
import jax.numpy as jnp
from jax.experimental import pallas as pl
from jax.experimental.pallas import tpu as pltpu

POOL = 4
EPS = 1e-5


def _resnet_block_kernel(x_ref, col_ref, w_ref, b_ref, gamma_ref, beta_ref,
                         out_ref, *, W, fsize, dilv, pad):
    # x_ref   : (Cin, L) f32  row-major flattened input, zero-padded so that
    #           original pixel (h, w) lives at flat index h*W + w + pad*(W+1).
    # col_ref : (1, HW) int32 output-column index (q mod W), used for masking.
    # w_ref   : (POOL*fsize*fsize, Cout, Cin) bf16 conv weights, pool-slab major.
    # b_ref   : (POOL, Cout, 1) f32 conv bias, pool-slab major.
    # gamma_ref, beta_ref : (Cout, 1) f32 InstanceNorm affine params.
    # out_ref : (Cout, HW) f32.
    cout, hw = out_ref.shape
    ntaps = fsize * fsize

    col = col_ref[...]                                   # (1, HW)

    # Column masks (only taps whose horizontal shift leaves the row need one).
    masks = {}
    for kw in range(fsize):
        s = kw * dilv - pad
        lo, hi = max(0, -s), min(W, W - s)
        if lo > 0 or hi < W:
            masks[kw] = (col >= lo) & (col < hi)

    # ---- fused im2col: fsize*fsize shifted slices of the flat input --------
    # Output position q = h*W + w reads flat index q + kh*dilv*W + kw*dilv for
    # tap (kh, kw).  Vertical padding is real zeros in x_ref; horizontal
    # padding is applied with the column mask.
    xs = []
    for kh in range(fsize):
        for kw in range(fsize):
            off = kh * dilv * W + kw * dilv
            v = x_ref[:, off:off + hw]                   # (Cin, HW) f32
            if kw in masks:
                v = jnp.where(masks[kw], v, 0.0)
            xs.append(v.astype(jnp.bfloat16))            # MXU operand

    # ---- Maxout convolution: POOL weight slabs, running maximum (pure VPU) --
    m = None
    for p in range(POOL):
        yp = jnp.zeros((cout, hw), jnp.float32) + b_ref[p]        # bias bcast
        for t in range(ntaps):
            yp = yp + jnp.dot(w_ref[p * ntaps + t], xs[t],
                              preferred_element_type=jnp.float32)
        m = yp if m is None else jnp.maximum(m, yp)               # (Cout, HW)

    # ---- InstanceNorm2d: per-channel stats over the HW (lane) axis ----------
    mean = jnp.mean(m, axis=1, keepdims=True)
    var = jnp.mean(jnp.square(m - mean), axis=1, keepdims=True)
    y = (m - mean) * jax.lax.rsqrt(var + EPS)
    y = y * gamma_ref[...] + beta_ref[...]

    # ---- Residual add: the center-tap slice IS the original image (f32) -----
    res = x_ref[:, pad * (W + 1):pad * (W + 1) + hw]              # (Cout, HW)
    out_ref[...] = y + res


@functools.partial(jax.jit, static_argnames=("fsize", "dilv"))
def resnet_block_forward(x, w, b, gamma, beta, *, fsize, dilv):
    """x: (N, Cin, H, W) f32.  w: (POOL*Cout, Cin, fsize, fsize).  Cin == Cout."""
    N, Cin, H, Wd = x.shape
    Cout4 = w.shape[0]
    Cout = Cout4 // POOL
    assert Cin == Cout, "ResNet_Block residual requires width_in == width_out"
    HW = H * Wd
    pad = dilv * (fsize - 1) // 2
    ntaps = fsize * fsize
    L = HW + 2 * pad * (Wd + 1)

    # Flat row-major input, zero-padded so every conv tap is a pure shift.
    xflat = jnp.pad(x.reshape(N, Cin, HW).astype(jnp.float32),
                    ((0, 0), (0, 0), (pad * (Wd + 1), pad * (Wd + 1))))

    # Weights: (Cout4, Cin, fh, fw) -> (POOL*taps, Cout, Cin), pool-slab major.
    # PyTorch maxout group o takes consecutive conv channels [o*POOL, o*POOL+POOL).
    w_r = w.reshape(Cout, POOL, Cin, fsize, fsize)
    w_r = w_r.transpose(1, 3, 4, 0, 2).reshape(POOL * ntaps, Cout, Cin)
    w_r = w_r.astype(jnp.bfloat16)                        # MXU operand (f32 accum)
    b_r = b.reshape(Cout, POOL).T.reshape(POOL, Cout, 1).astype(jnp.float32)

    colmap = (jnp.arange(HW, dtype=jnp.int32) % Wd).reshape(1, HW)

    kernel = functools.partial(_resnet_block_kernel, W=Wd, fsize=fsize,
                               dilv=dilv, pad=pad)

    # Explicit VMEM budget: double-buffered in/out blocks + in-kernel temporaries.
    est = 4 * (Cin * L * 4 + Cout * HW * 4) + 24 * Cin * HW * 4 + POOL * ntaps * Cout * Cin * 2
    vmem_limit = int(min(48 * 2**20, max(32 * 2**20, 2 * est)))

    out = pl.pallas_call(
        kernel,
        out_shape=jax.ShapeDtypeStruct((N, Cout, HW), jnp.float32),
        grid=(N,),
        in_specs=[
            pl.BlockSpec((None, Cin, L), lambda n: (n, 0, 0)),             # x (per sample)
            pl.BlockSpec((1, HW), lambda n: (0, 0)),                       # column map
            pl.BlockSpec((POOL * ntaps, Cout, Cin), lambda n: (0, 0, 0)),  # weights (resident)
            pl.BlockSpec((POOL, Cout, 1), lambda n: (0, 0, 0)),            # bias
            pl.BlockSpec((Cout, 1), lambda n: (0, 0)),                     # gamma
            pl.BlockSpec((Cout, 1), lambda n: (0, 0)),                     # beta
        ],
        out_specs=pl.BlockSpec((None, Cout, HW), lambda n: (n, 0, 0)),
        compiler_params=pltpu.CompilerParams(
            dimension_semantics=("parallel",),     # N >= 2 feeds both v7x TCs
            vmem_limit_bytes=vmem_limit),
    )(xflat, colmap, w_r, b_r,
      gamma.reshape(Cout, 1).astype(jnp.float32),
      beta.reshape(Cout, 1).astype(jnp.float32))

    return out.reshape(N, Cout, H, Wd)


def ref_forward(x, w, b, gamma, beta, fsize, dilv):
    """Pure-JAX (f32) reference mirroring the PyTorch module."""
    pad = dilv * (fsize - 1) // 2
    y = jax.lax.conv_general_dilated(
        x, w, window_strides=(1, 1), padding=[(pad, pad), (pad, pad)],
        rhs_dilation=(dilv, dilv),
        dimension_numbers=("NCHW", "OIHW", "NCHW"))
    y = y + b[None, :, None, None]
    N, C, H, W = y.shape
    y = y.reshape(N, C // POOL, POOL, H, W).max(axis=2)
    mean = y.mean(axis=(2, 3), keepdims=True)
    var = ((y - mean) ** 2).mean(axis=(2, 3), keepdims=True)
    yn = (y - mean) / jnp.sqrt(var + EPS)
    yn = yn * gamma[None, :, None, None] + beta[None, :, None, None]
    return yn + x


if __name__ == "__main__":
    def run_case(N, width, H, W, fsize, dilv):
        Cout4 = width * POOL
        key = jax.random.PRNGKey(0)
        kx, kw, kb, kg, kbt = jax.random.split(key, 5)

        x = jax.random.normal(kx, (N, width, H, W), dtype=jnp.float32)

        # Conv2d weight: xavier_uniform with gain sqrt(2) (as in Maxout2d.__init__)
        fan_in = width * fsize * fsize
        fan_out = Cout4 * fsize * fsize
        bound_w = np.sqrt(2.0) * np.sqrt(6.0 / (fan_in + fan_out))
        w = jax.random.uniform(kw, (Cout4, width, fsize, fsize),
                               minval=-bound_w, maxval=bound_w, dtype=jnp.float32)
        # Conv2d bias: default PyTorch init U(-1/sqrt(fan_in), 1/sqrt(fan_in))
        bound_b = 1.0 / np.sqrt(fan_in)
        b = jax.random.uniform(kb, (Cout4,), minval=-bound_b, maxval=bound_b,
                               dtype=jnp.float32)
        # InstanceNorm2d affine params (perturbed to exercise the affine path)
        gamma = 1.0 + 0.05 * jax.random.normal(kg, (width,), dtype=jnp.float32)
        beta = 0.05 * jax.random.normal(kbt, (width,), dtype=jnp.float32)

        out = jax.block_until_ready(
            resnet_block_forward(x, w, b, gamma, beta, fsize=fsize, dilv=dilv))
        ref = jax.block_until_ready(ref_forward(x, w, b, gamma, beta, fsize, dilv))
        # bf16 MXU operands (f32 accumulation) -> ~1e-3 relative conv error,
        # so compare with a tolerance that still catches any structural bug.
        np.testing.assert_allclose(np.asarray(out), np.asarray(ref),
                                   rtol=5e-2, atol=5e-2)

    run_case(N=2, width=4, H=16, W=16, fsize=3, dilv=1)   # primary config
    run_case(N=3, width=8, H=16, W=16, fsize=3, dilv=2)   # dilated config
    print("KERNEL_OK")
</pallas_src>

<mosaic_0001>
module attributes {stable_mosaic.version = 11 : i64} {
  func.func @_resnet_block_kernel(%arg0: i32, %arg1: memref<1x4x290xf32, #tpu.memory_space<vmem>>, %arg2: memref<1x256xi32, #tpu.memory_space<vmem>>, %arg3: memref<36x4x4xbf16, #tpu.memory_space<vmem>>, %arg4: memref<4x4x1xf32, #tpu.memory_space<vmem>>, %arg5: memref<4x1xf32, #tpu.memory_space<vmem>>, %arg6: memref<4x1xf32, #tpu.memory_space<vmem>>, %arg7: memref<1x4x256xf32, #tpu.memory_space<vmem>>) attributes {dimension_semantics = [#tpu.dimension_semantics<parallel>], iteration_bounds = array<i64: 2>, scalar_prefetch = 0 : i64, scratch_operands = 0 : i64, tpu.core_type = #tpu.core_type<tc>, window_params = [{transform_indices = @transform_0, window_bounds = array<i64: 1, 4, 290>}, {pipeline_mode = #tpu.pipeline_mode<synchronous>, transform_indices = @transform_1, window_bounds = array<i64: 1, 256>}, {pipeline_mode = #tpu.pipeline_mode<synchronous>, transform_indices = @transform_2, window_bounds = array<i64: 36, 4, 4>}, {pipeline_mode = #tpu.pipeline_mode<synchronous>, transform_indices = @transform_3, window_bounds = array<i64: 4, 4, 1>}, {pipeline_mode = #tpu.pipeline_mode<synchronous>, transform_indices = @transform_4, window_bounds = array<i64: 4, 1>}, {pipeline_mode = #tpu.pipeline_mode<synchronous>, transform_indices = @transform_5, window_bounds = array<i64: 4, 1>}, {transform_indices = @transform_6, window_bounds = array<i64: 1, 4, 256>}]} {
    %c0 = arith.constant 0 : index
    %c0_0 = arith.constant 0 : index
    %0 = vector.load %arg2[%c0, %c0_0] : memref<1x256xi32, #tpu.memory_space<vmem>>, vector<1x256xi32>
    %c1_i32 = arith.constant 1 : i32
    %1 = vector.broadcast %c1_i32 : i32 to vector<1x256xi32>
    %2 = arith.cmpi sge, %0, %1 : vector<1x256xi32>
    %c16_i32 = arith.constant 16 : i32
    %3 = vector.broadcast %c16_i32 : i32 to vector<1x256xi32>
    %4 = arith.cmpi slt, %0, %3 : vector<1x256xi32>
    %5 = arith.andi %2, %4 : vector<1x256xi1>
    %c0_i32 = arith.constant 0 : i32
    %6 = vector.broadcast %c0_i32 : i32 to vector<1x256xi32>
    %7 = arith.cmpi sge, %0, %6 : vector<1x256xi32>
    %c15_i32 = arith.constant 15 : i32
    %8 = vector.broadcast %c15_i32 : i32 to vector<1x256xi32>
    %9 = arith.cmpi slt, %0, %8 : vector<1x256xi32>
    %10 = arith.andi %7, %9 : vector<1x256xi1>
    %c0_1 = arith.constant 0 : index
    %c0_2 = arith.constant 0 : index
    %c0_3 = arith.constant 0 : index
    %11 = vector.load %arg1[%c0_1, %c0_2, %c0_3] : memref<1x4x290xf32, #tpu.memory_space<vmem>>, vector<1x4x256xf32>
    %12 = vector.shape_cast %11 : vector<1x4x256xf32> to vector<4x256xf32>
    %cst = arith.constant 0.000000e+00 : f32
    %13 = vector.shape_cast %5 : vector<1x256xi1> to vector<1x256xi1>
    %14 = vector.broadcast %13 : vector<1x256xi1> to vector<4x256xi1>
    %15 = vector.broadcast %cst : f32 to vector<4x256xf32>
    %16 = arith.select %14, %12, %15 : vector<4x256xi1>, vector<4x256xf32>
    %17 = arith.truncf %16 : vector<4x256xf32> to vector<4x256xbf16>
    %c0_4 = arith.constant 0 : index
    %c0_5 = arith.constant 0 : index
    %c1 = arith.constant 1 : index
    %18 = vector.load %arg1[%c0_4, %c0_5, %c1] : memref<1x4x290xf32, #tpu.memory_space<vmem>>, vector<1x4x256xf32>
    %19 = vector.shape_cast %18 : vector<1x4x256xf32> to vector<4x256xf32>
    %20 = arith.truncf %19 : vector<4x256xf32> to vector<4x256xbf16>
    %c0_6 = arith.constant 0 : index
    %c0_7 = arith.constant 0 : index
    %c2 = arith.constant 2 : index
    %21 = vector.load %arg1[%c0_6, %c0_7, %c2] : memref<1x4x290xf32, #tpu.memory_space<vmem>>, vector<1x4x256xf32>
    %22 = vector.shape_cast %21 : vector<1x4x256xf32> to vector<4x256xf32>
    %cst_8 = arith.constant 0.000000e+00 : f32
    %23 = vector.shape_cast %10 : vector<1x256xi1> to vector<1x256xi1>
    %24 = vector.broadcast %23 : vector<1x256xi1> to vector<4x256xi1>
    %25 = vector.broadcast %cst_8 : f32 to vector<4x256xf32>
    %26 = arith.select %24, %22, %25 : vector<4x256xi1>, vector<4x256xf32>
    %27 = arith.truncf %26 : vector<4x256xf32> to vector<4x256xbf16>
    %c0_9 = arith.constant 0 : index
    %c0_10 = arith.constant 0 : index
    %c16 = arith.constant 16 : index
    %28 = vector.load %arg1[%c0_9, %c0_10, %c16] : memref<1x4x290xf32, #tpu.memory_space<vmem>>, vector<1x4x256xf32>
    %29 = vector.shape_cast %28 : vector<1x4x256xf32> to vector<4x256xf32>
    %cst_11 = arith.constant 0.000000e+00 : f32
    %30 = vector.shape_cast %5 : vector<1x256xi1> to vector<1x256xi1>
    %31 = vector.broadcast %30 : vector<1x256xi1> to vector<4x256xi1>
    %32 = vector.broadcast %cst_11 : f32 to vector<4x256xf32>
    %33 = arith.select %31, %29, %32 : vector<4x256xi1>, vector<4x256xf32>
    %34 = arith.truncf %33 : vector<4x256xf32> to vector<4x256xbf16>
    %c0_12 = arith.constant 0 : index
    %c0_13 = arith.constant 0 : index
    %c17 = arith.constant 17 : index
    %35 = vector.load %arg1[%c0_12, %c0_13, %c17] : memref<1x4x290xf32, #tpu.memory_space<vmem>>, vector<1x4x256xf32>
    %36 = vector.shape_cast %35 : vector<1x4x256xf32> to vector<4x256xf32>
    %37 = arith.truncf %36 : vector<4x256xf32> to vector<4x256xbf16>
    %c0_14 = arith.constant 0 : index
    %c0_15 = arith.constant 0 : index
    %c18 = arith.constant 18 : index
    %38 = vector.load %arg1[%c0_14, %c0_15, %c18] : memref<1x4x290xf32, #tpu.memory_space<vmem>>, vector<1x4x256xf32>
    %39 = vector.shape_cast %38 : vector<1x4x256xf32> to vector<4x256xf32>
    %cst_16 = arith.constant 0.000000e+00 : f32
    %40 = vector.shape_cast %10 : vector<1x256xi1> to vector<1x256xi1>
    %41 = vector.broadcast %40 : vector<1x256xi1> to vector<4x256xi1>
    %42 = vector.broadcast %cst_16 : f32 to vector<4x256xf32>
    %43 = arith.select %41, %39, %42 : vector<4x256xi1>, vector<4x256xf32>
    %44 = arith.truncf %43 : vector<4x256xf32> to vector<4x256xbf16>
    %c0_17 = arith.constant 0 : index
    %c0_18 = arith.constant 0 : index
    %c32 = arith.constant 32 : index
    %45 = vector.load %arg1[%c0_17, %c0_18, %c32] : memref<1x4x290xf32, #tpu.memory_space<vmem>>, vector<1x4x256xf32>
    %46 = vector.shape_cast %45 : vector<1x4x256xf32> to vector<4x256xf32>
    %cst_19 = arith.constant 0.000000e+00 : f32
    %47 = vector.shape_cast %5 : vector<1x256xi1> to vector<1x256xi1>
    %48 = vector.broadcast %47 : vector<1x256xi1> to vector<4x256xi1>
    %49 = vector.broadcast %cst_19 : f32 to vector<4x256xf32>
    %50 = arith.select %48, %46, %49 : vector<4x256xi1>, vector<4x256xf32>
    %51 = arith.truncf %50 : vector<4x256xf32> to vector<4x256xbf16>
    %c0_20 = arith.constant 0 : index
    %c0_21 = arith.constant 0 : index
    %c33 = arith.constant 33 : index
    %52 = vector.load %arg1[%c0_20, %c0_21, %c33] : memref<1x4x290xf32, #tpu.memory_space<vmem>>, vector<1x4x256xf32>
    %53 = vector.shape_cast %52 : vector<1x4x256xf32> to vector<4x256xf32>
    %54 = arith.truncf %53 : vector<4x256xf32> to vector<4x256xbf16>
    %c0_22 = arith.constant 0 : index
    %c0_23 = arith.constant 0 : index
    %c34 = arith.constant 34 : index
    %55 = vector.load %arg1[%c0_22, %c0_23, %c34] : memref<1x4x290xf32, #tpu.memory_space<vmem>>, vector<1x4x256xf32>
    %56 = vector.shape_cast %55 : vector<1x4x256xf32> to vector<4x256xf32>
    %cst_24 = arith.constant 0.000000e+00 : f32
    %57 = vector.shape_cast %10 : vector<1x256xi1> to vector<1x256xi1>
    %58 = vector.broadcast %57 : vector<1x256xi1> to vector<4x256xi1>
    %59 = vector.broadcast %cst_24 : f32 to vector<4x256xf32>
    %60 = arith.select %58, %56, %59 : vector<4x256xi1>, vector<4x256xf32>
    %61 = arith.truncf %60 : vector<4x256xf32> to vector<4x256xbf16>
    %cst_25 = arith.constant 0.000000e+00 : f32
    %62 = vector.broadcast %cst_25 : f32 to vector<4x256xf32>
    %c0_26 = arith.constant 0 : index
    %c0_27 = arith.constant 0 : index
    %c0_28 = arith.constant 0 : index
    %63 = vector.load %arg4[%c0_26, %c0_27, %c0_28] : memref<4x4x1xf32, #tpu.memory_space<vmem>>, vector<1x4x1xf32>
    %64 = vector.shape_cast %63 : vector<1x4x1xf32> to vector<4x1xf32>
    %65 = vector.broadcast %64 : vector<4x1xf32> to vector<4x256xf32>
    %66 = arith.addf %62, %65 : vector<4x256xf32>
    %c0_29 = arith.constant 0 : index
    %c0_30 = arith.constant 0 : index
    %c0_31 = arith.constant 0 : index
    %67 = vector.load %arg3[%c0_29, %c0_30, %c0_31] : memref<36x4x4xbf16, #tpu.memory_space<vmem>>, vector<1x4x4xbf16>
    %68 = vector.shape_cast %67 : vector<1x4x4xbf16> to vector<4x4xbf16>
    %cst_32 = arith.constant dense<0.000000e+00> : vector<4x256xf32>
    %69 = tpu.matmul %68, %17, %cst_32 {dimension_numbers = #tpu.dot_dimension_numbers<[1], [0], [0], [1], [0, 0, 1, 1], [], []>} : vector<4x4xbf16>, vector<4x256xbf16>, vector<4x256xf32> -> vector<4x256xf32>
    %70 = arith.addf %66, %69 : vector<4x256xf32>
    %c1_33 = arith.constant 1 : index
    %c0_34 = arith.constant 0 : index
    %c0_35 = arith.constant 0 : index
    %71 = vector.load %arg3[%c1_33, %c0_34, %c0_35] : memref<36x4x4xbf16, #tpu.memory_space<vmem>>, vector<1x4x4xbf16>
    %72 = vector.shape_cast %71 : vector<1x4x4xbf16> to vector<4x4xbf16>
    %cst_36 = arith.constant dense<0.000000e+00> : vector<4x256xf32>
    %73 = tpu.matmul %72, %20, %cst_36 {dimension_numbers = #tpu.dot_dimension_numbers<[1], [0], [0], [1], [0, 0, 1, 1], [], []>} : vector<4x4xbf16>, vector<4x256xbf16>, vector<4x256xf32> -> vector<4x256xf32>
    %74 = arith.addf %70, %73 : vector<4x256xf32>
    %c2_37 = arith.constant 2 : index
    %c0_38 = arith.constant 0 : index
    %c0_39 = arith.constant 0 : index
    %75 = vector.load %arg3[%c2_37, %c0_38, %c0_39] : memref<36x4x4xbf16, #tpu.memory_space<vmem>>, vector<1x4x4xbf16>
    %76 = vector.shape_cast %75 : vector<1x4x4xbf16> to vector<4x4xbf16>
    %cst_40 = arith.constant dense<0.000000e+00> : vector<4x256xf32>
    %77 = tpu.matmul %76, %27, %cst_40 {dimension_numbers = #tpu.dot_dimension_numbers<[1], [0], [0], [1], [0, 0, 1, 1], [], []>} : vector<4x4xbf16>, vector<4x256xbf16>, vector<4x256xf32> -> vector<4x256xf32>
    %78 = arith.addf %74, %77 : vector<4x256xf32>
    %c3 = arith.constant 3 : index
    %c0_41 = arith.constant 0 : index
    %c0_42 = arith.constant 0 : index
    %79 = vector.load %arg3[%c3, %c0_41, %c0_42] : memref<36x4x4xbf16, #tpu.memory_space<vmem>>, vector<1x4x4xbf16>
    %80 = vector.shape_cast %79 : vector<1x4x4xbf16> to vector<4x4xbf16>
    %cst_43 = arith.constant dense<0.000000e+00> : vector<4x256xf32>
    %81 = tpu.matmul %80, %34, %cst_43 {dimension_numbers = #tpu.dot_dimension_numbers<[1], [0], [0], [1], [0, 0, 1, 1], [], []>} : vector<4x4xbf16>, vector<4x256xbf16>, vector<4x256xf32> -> vector<4x256xf32>
    %82 = arith.addf %78, %81 : vector<4x256xf32>
    %c4 = arith.constant 4 : index
    %c0_44 = arith.constant 0 : index
    %c0_45 = arith.constant 0 : index
    %83 = vector.load %arg3[%c4, %c0_44, %c0_45] : memref<36x4x4xbf16, #tpu.memory_space<vmem>>, vector<1x4x4xbf16>
    %84 = vector.shape_cast %83 : vector<1x4x4xbf16> to vector<4x4xbf16>
    %cst_46 = arith.constant dense<0.000000e+00> : vector<4x256xf32>
    %85 = tpu.matmul %84, %37, %cst_46 {dimension_numbers = #tpu.dot_dimension_numbers<[1], [0], [0], [1], [0, 0, 1, 1], [], []>} : vector<4x4xbf16>, vector<4x256xbf16>, vector<4x256xf32> -> vector<4x256xf32>
    %86 = arith.addf %82, %85 : vector<4x256xf32>
    %c5 = arith.constant 5 : index
    %c0_47 = arith.constant 0 : index
    %c0_48 = arith.constant 0 : index
    %87 = vector.load %arg3[%c5, %c0_47, %c0_48] : memref<36x4x4xbf16, #tpu.memory_space<vmem>>, vector<1x4x4xbf16>
    %88 = vector.shape_cast %87 : vector<1x4x4xbf16> to vector<4x4xbf16>
    %cst_49 = arith.constant dense<0.000000e+00> : vector<4x256xf32>
    %89 = tpu.matmul %88, %44, %cst_49 {dimension_numbers = #tpu.dot_dimension_numbers<[1], [0], [0], [1], [0, 0, 1, 1], [], []>} : vector<4x4xbf16>, vector<4x256xbf16>, vector<4x256xf32> -> vector<4x256xf32>
    %90 = arith.addf %86, %89 : vector<4x256xf32>
    %c6 = arith.constant 6 : index
    %c0_50 = arith.constant 0 : index
    %c0_51 = arith.constant 0 : index
    %91 = vector.load %arg3[%c6, %c0_50, %c0_51] : memref<36x4x4xbf16, #tpu.memory_space<vmem>>, vector<1x4x4xbf16>
    %92 = vector.shape_cast %91 : vector<1x4x4xbf16> to vector<4x4xbf16>
    %cst_52 = arith.constant dense<0.000000e+00> : vector<4x256xf32>
    %93 = tpu.matmul %92, %51, %cst_52 {dimension_numbers = #tpu.dot_dimension_numbers<[1], [0], [0], [1], [0, 0, 1, 1], [], []>} : vector<4x4xbf16>, vector<4x256xbf16>, vector<4x256xf32> -> vector<4x256xf32>
    %94 = arith.addf %90, %93 : vector<4x256xf32>
    %c7 = arith.constant 7 : index
    %c0_53 = arith.constant 0 : index
    %c0_54 = arith.constant 0 : index
    %95 = vector.load %arg3[%c7, %c0_53, %c0_54] : memref<36x4x4xbf16, #tpu.memory_space<vmem>>, vector<1x4x4xbf16>
    %96 = vector.shape_cast %95 : vector<1x4x4xbf16> to vector<4x4xbf16>
    %cst_55 = arith.constant dense<0.000000e+00> : vector<4x256xf32>
    %97 = tpu.matmul %96, %54, %cst_55 {dimension_numbers = #tpu.dot_dimension_numbers<[1], [0], [0], [1], [0, 0, 1, 1], [], []>} : vector<4x4xbf16>, vector<4x256xbf16>, vector<4x256xf32> -> vector<4x256xf32>
    %98 = arith.addf %94, %97 : vector<4x256xf32>
    %c8 = arith.constant 8 : index
    %c0_56 = arith.constant 0 : index
    %c0_57 = arith.constant 0 : index
    %99 = vector.load %arg3[%c8, %c0_56, %c0_57] : memref<36x4x4xbf16, #tpu.memory_space<vmem>>, vector<1x4x4xbf16>
    %100 = vector.shape_cast %99 : vector<1x4x4xbf16> to vector<4x4xbf16>
    %cst_58 = arith.constant dense<0.000000e+00> : vector<4x256xf32>
    %101 = tpu.matmul %100, %61, %cst_58 {dimension_numbers = #tpu.dot_dimension_numbers<[1], [0], [0], [1], [0, 0, 1, 1], [], []>} : vector<4x4xbf16>, vector<4x256xbf16>, vector<4x256xf32> -> vector<4x256xf32>
    %102 = arith.addf %98, %101 : vector<4x256xf32>
    %cst_59 = arith.constant 0.000000e+00 : f32
    %103 = vector.broadcast %cst_59 : f32 to vector<4x256xf32>
    %c1_60 = arith.constant 1 : index
    %c0_61 = arith.constant 0 : index
    %c0_62 = arith.constant 0 : index
    %104 = vector.load %arg4[%c1_60, %c0_61, %c0_62] : memref<4x4x1xf32, #tpu.memory_space<vmem>>, vector<1x4x1xf32>
    %105 = vector.shape_cast %104 : vector<1x4x1xf32> to vector<4x1xf32>
    %106 = vector.broadcast %105 : vector<4x1xf32> to vector<4x256xf32>
    %107 = arith.addf %103, %106 : vector<4x256xf32>
    %c9 = arith.constant 9 : index
    %c0_63 = arith.constant 0 : index
    %c0_64 = arith.constant 0 : index
    %108 = vector.load %arg3[%c9, %c0_63, %c0_64] : memref<36x4x4xbf16, #tpu.memory_space<vmem>>, vector<1x4x4xbf16>
    %109 = vector.shape_cast %108 : vector<1x4x4xbf16> to vector<4x4xbf16>
    %cst_65 = arith.constant dense<0.000000e+00> : vector<4x256xf32>
    %110 = tpu.matmul %109, %17, %cst_65 {dimension_numbers = #tpu.dot_dimension_numbers<[1], [0], [0], [1], [0, 0, 1, 1], [], []>} : vector<4x4xbf16>, vector<4x256xbf16>, vector<4x256xf32> -> vector<4x256xf32>
    %111 = arith.addf %107, %110 : vector<4x256xf32>
    %c10 = arith.constant 10 : index
    %c0_66 = arith.constant 0 : index
    %c0_67 = arith.constant 0 : index
    %112 = vector.load %arg3[%c10, %c0_66, %c0_67] : memref<36x4x4xbf16, #tpu.memory_space<vmem>>, vector<1x4x4xbf16>
    %113 = vector.shape_cast %112 : vector<1x4x4xbf16> to vector<4x4xbf16>
    %cst_68 = arith.constant dense<0.000000e+00> : vector<4x256xf32>
    %114 = tpu.matmul %113, %20, %cst_68 {dimension_numbers = #tpu.dot_dimension_numbers<[1], [0], [0], [1], [0, 0, 1, 1], [], []>} : vector<4x4xbf16>, vector<4x256xbf16>, vector<4x256xf32> -> vector<4x256xf32>
    %115 = arith.addf %111, %114 : vector<4x256xf32>
    %c11 = arith.constant 11 : index
    %c0_69 = arith.constant 0 : index
    %c0_70 = arith.constant 0 : index
    %116 = vector.load %arg3[%c11, %c0_69, %c0_70] : memref<36x4x4xbf16, #tpu.memory_space<vmem>>, vector<1x4x4xbf16>
    %117 = vector.shape_cast %116 : vector<1x4x4xbf16> to vector<4x4xbf16>
    %cst_71 = arith.constant dense<0.000000e+00> : vector<4x256xf32>
    %118 = tpu.matmul %117, %27, %cst_71 {dimension_numbers = #tpu.dot_dimension_numbers<[1], [0], [0], [1], [0, 0, 1, 1], [], []>} : vector<4x4xbf16>, vector<4x256xbf16>, vector<4x256xf32> -> vector<4x256xf32>
    %119 = arith.addf %115, %118 : vector<4x256xf32>
    %c12 = arith.constant 12 : index
    %c0_72 = arith.constant 0 : index
    %c0_73 = arith.constant 0 : index
    %120 = vector.load %arg3[%c12, %c0_72, %c0_73] : memref<36x4x4xbf16, #tpu.memory_space<vmem>>, vector<1x4x4xbf16>
    %121 = vector.shape_cast %120 : vector<1x4x4xbf16> to vector<4x4xbf16>
    %cst_74 = arith.constant dense<0.000000e+00> : vector<4x256xf32>
    %122 = tpu.matmul %121, %34, %cst_74 {dimension_numbers = #tpu.dot_dimension_numbers<[1], [0], [0], [1], [0, 0, 1, 1], [], []>} : vector<4x4xbf16>, vector<4x256xbf16>, vector<4x256xf32> -> vector<4x256xf32>
    %123 = arith.addf %119, %122 : vector<4x256xf32>
    %c13 = arith.constant 13 : index
    %c0_75 = arith.constant 0 : index
    %c0_76 = arith.constant 0 : index
    %124 = vector.load %arg3[%c13, %c0_75, %c0_76] : memref<36x4x4xbf16, #tpu.memory_space<vmem>>, vector<1x4x4xbf16>
    %125 = vector.shape_cast %124 : vector<1x4x4xbf16> to vector<4x4xbf16>
    %cst_77 = arith.constant dense<0.000000e+00> : vector<4x256xf32>
    %126 = tpu.matmul %125, %37, %cst_77 {dimension_numbers = #tpu.dot_dimension_numbers<[1], [0], [0], [1], [0, 0, 1, 1], [], []>} : vector<4x4xbf16>, vector<4x256xbf16>, vector<4x256xf32> -> vector<4x256xf32>
    %127 = arith.addf %123, %126 : vector<4x256xf32>
    %c14 = arith.constant 14 : index
    %c0_78 = arith.constant 0 : index
    %c0_79 = arith.constant 0 : index
    %128 = vector.load %arg3[%c14, %c0_78, %c0_79] : memref<36x4x4xbf16, #tpu.memory_space<vmem>>, vector<1x4x4xbf16>
    %129 = vector.shape_cast %128 : vector<1x4x4xbf16> to vector<4x4xbf16>
    %cst_80 = arith.constant dense<0.000000e+00> : vector<4x256xf32>
    %130 = tpu.matmul %129, %44, %cst_80 {dimension_numbers = #tpu.dot_dimension_numbers<[1], [0], [0], [1], [0, 0, 1, 1], [], []>} : vector<4x4xbf16>, vector<4x256xbf16>, vector<4x256xf32> -> vector<4x256xf32>
    %131 = arith.addf %127, %130 : vector<4x256xf32>
    %c15 = arith.constant 15 : index
    %c0_81 = arith.constant 0 : index
    %c0_82 = arith.constant 0 : index
    %132 = vector.load %arg3[%c15, %c0_81, %c0_82] : memref<36x4x4xbf16, #tpu.memory_space<vmem>>, vector<1x4x4xbf16>
    %133 = vector.shape_cast %132 : vector<1x4x4xbf16> to vector<4x4xbf16>
    %cst_83 = arith.constant dense<0.000000e+00> : vector<4x256xf32>
    %134 = tpu.matmul %133, %51, %cst_83 {dimension_numbers = #tpu.dot_dimension_numbers<[1], [0], [0], [1], [0, 0, 1, 1], [], []>} : vector<4x4xbf16>, vector<4x256xbf16>, vector<4x256xf32> -> vector<4x256xf32>
    %135 = arith.addf %131, %134 : vector<4x256xf32>
    %c16_84 = arith.constant 16 : index
    %c0_85 = arith.constant 0 : index
    %c0_86 = arith.constant 0 : index
    %136 = vector.load %arg3[%c16_84, %c0_85, %c0_86] : memref<36x4x4xbf16, #tpu.memory_space<vmem>>, vector<1x4x4xbf16>
    %137 = vector.shape_cast %136 : vector<1x4x4xbf16> to vector<4x4xbf16>
    %cst_87 = arith.constant dense<0.000000e+00> : vector<4x256xf32>
    %138 = tpu.matmul %137, %54, %cst_87 {dimension_numbers = #tpu.dot_dimension_numbers<[1], [0], [0], [1], [0, 0, 1, 1], [], []>} : vector<4x4xbf16>, vector<4x256xbf16>, vector<4x256xf32> -> vector<4x256xf32>
    %139 = arith.addf %135, %138 : vector<4x256xf32>
    %c17_88 = arith.constant 17 : index
    %c0_89 = arith.constant 0 : index
    %c0_90 = arith.constant 0 : index
    %140 = vector.load %arg3[%c17_88, %c0_89, %c0_90] : memref<36x4x4xbf16, #tpu.memory_space<vmem>>, vector<1x4x4xbf16>
    %141 = vector.shape_cast %140 : vector<1x4x4xbf16> to vector<4x4xbf16>
    %cst_91 = arith.constant dense<0.000000e+00> : vector<4x256xf32>
    %142 = tpu.matmul %141, %61, %cst_91 {dimension_numbers = #tpu.dot_dimension_numbers<[1], [0], [0], [1], [0, 0, 1, 1], [], []>} : vector<4x4xbf16>, vector<4x256xbf16>, vector<4x256xf32> -> vector<4x256xf32>
    %143 = arith.addf %139, %142 : vector<4x256xf32>
    %144 = arith.maximumf %102, %143 : vector<4x256xf32>
    %cst_92 = arith.constant 0.000000e+00 : f32
    %145 = vector.broadcast %cst_92 : f32 to vector<4x256xf32>
    %c2_93 = arith.constant 2 : index
    %c0_94 = arith.constant 0 : index
    %c0_95 = arith.constant 0 : index
    %146 = vector.load %arg4[%c2_93, %c0_94, %c0_95] : memref<4x4x1xf32, #tpu.memory_space<vmem>>, vector<1x4x1xf32>
    %147 = vector.shape_cast %146 : vector<1x4x1xf32> to vector<4x1xf32>
    %148 = vector.broadcast %147 : vector<4x1xf32> to vector<4x256xf32>
    %149 = arith.addf %145, %148 : vector<4x256xf32>
    %c18_96 = arith.constant 18 : index
    %c0_97 = arith.constant 0 : index
    %c0_98 = arith.constant 0 : index
    %150 = vector.load %arg3[%c18_96, %c0_97, %c0_98] : memref<36x4x4xbf16, #tpu.memory_space<vmem>>, vector<1x4x4xbf16>
    %151 = vector.shape_cast %150 : vector<1x4x4xbf16> to vector<4x4xbf16>
    %cst_99 = arith.constant dense<0.000000e+00> : vector<4x256xf32>
    %152 = tpu.matmul %151, %17, %cst_99 {dimension_numbers = #tpu.dot_dimension_numbers<[1], [0], [0], [1], [0, 0, 1, 1], [], []>} : vector<4x4xbf16>, vector<4x256xbf16>, vector<4x256xf32> -> vector<4x256xf32>
    %153 = arith.addf %149, %152 : vector<4x256xf32>
    %c19 = arith.constant 19 : index
    %c0_100 = arith.constant 0 : index
    %c0_101 = arith.constant 0 : index
    %154 = vector.load %arg3[%c19, %c0_100, %c0_101] : memref<36x4x4xbf16, #tpu.memory_space<vmem>>, vector<1x4x4xbf16>
    %155 = vector.shape_cast %154 : vector<1x4x4xbf16> to vector<4x4xbf16>
    %cst_102 = arith.constant dense<0.000000e+00> : vector<4x256xf32>
    %156 = tpu.matmul %155, %20, %cst_102 {dimension_numbers = #tpu.dot_dimension_numbers<[1], [0], [0], [1], [0, 0, 1, 1], [], []>} : vector<4x4xbf16>, vector<4x256xbf16>, vector<4x256xf32> -> vector<4x256xf32>
    %157 = arith.addf %153, %156 : vector<4x256xf32>
    %c20 = arith.constant 20 : index
    %c0_103 = arith.constant 0 : index
    %c0_104 = arith.constant 0 : index
    %158 = vector.load %arg3[%c20, %c0_103, %c0_104] : memref<36x4x4xbf16, #tpu.memory_space<vmem>>, vector<1x4x4xbf16>
    %159 = vector.shape_cast %158 : vector<1x4x4xbf16> to vector<4x4xbf16>
    %cst_105 = arith.constant dense<0.000000e+00> : vector<4x256xf32>
    %160 = tpu.matmul %159, %27, %cst_105 {dimension_numbers = #tpu.dot_dimension_numbers<[1], [0], [0], [1], [0, 0, 1, 1], [], []>} : vector<4x4xbf16>, vector<4x256xbf16>, vector<4x256xf32> -> vector<4x256xf32>
    %161 = arith.addf %157, %160 : vector<4x256xf32>
    %c21 = arith.constant 21 : index
    %c0_106 = arith.constant 0 : index
    %c0_107 = arith.constant 0 : index
    %162 = vector.load %arg3[%c21, %c0_106, %c0_107] : memref<36x4x4xbf16, #tpu.memory_space<vmem>>, vector<1x4x4xbf16>
    %163 = vector.shape_cast %162 : vector<1x4x4xbf16> to vector<4x4xbf16>
    %cst_108 = arith.constant dense<0.000000e+00> : vector<4x256xf32>
    %164 = tpu.matmul %163, %34, %cst_108 {dimension_numbers = #tpu.dot_dimension_numbers<[1], [0], [0], [1], [0, 0, 1, 1], [], []>} : vector<4x4xbf16>, vector<4x256xbf16>, vector<4x256xf32> -> vector<4x256xf32>
    %165 = arith.addf %161, %164 : vector<4x256xf32>
    %c22 = arith.constant 22 : index
    %c0_109 = arith.constant 0 : index
    %c0_110 = arith.constant 0 : index
    %166 = vector.load %arg3[%c22, %c0_109, %c0_110] : memref<36x4x4xbf16, #tpu.memory_space<vmem>>, vector<1x4x4xbf16>
    %167 = vector.shape_cast %166 : vector<1x4x4xbf16> to vector<4x4xbf16>
    %cst_111 = arith.constant dense<0.000000e+00> : vector<4x256xf32>
    %168 = tpu.matmul %167, %37, %cst_111 {dimension_numbers = #tpu.dot_dimension_numbers<[1], [0], [0], [1], [0, 0, 1, 1], [], []>} : vector<4x4xbf16>, vector<4x256xbf16>, vector<4x256xf32> -> vector<4x256xf32>
    %169 = arith.addf %165, %168 : vector<4x256xf32>
    %c23 = arith.constant 23 : index
    %c0_112 = arith.constant 0 : index
    %c0_113 = arith.constant 0 : index
    %170 = vector.load %arg3[%c23, %c0_112, %c0_113] : memref<36x4x4xbf16, #tpu.memory_space<vmem>>, vector<1x4x4xbf16>
    %171 = vector.shape_cast %170 : vector<1x4x4xbf16> to vector<4x4xbf16>
    %cst_114 = arith.constant dense<0.000000e+00> : vector<4x256xf32>
    %172 = tpu.matmul %171, %44, %cst_114 {dimension_numbers = #tpu.dot_dimension_numbers<[1], [0], [0], [1], [0, 0, 1, 1], [], []>} : vector<4x4xbf16>, vector<4x256xbf16>, vector<4x256xf32> -> vector<4x256xf32>
    %173 = arith.addf %169, %172 : vector<4x256xf32>
    %c24 = arith.constant 24 : index
    %c0_115 = arith.constant 0 : index
    %c0_116 = arith.constant 0 : index
    %174 = vector.load %arg3[%c24, %c0_115, %c0_116] : memref<36x4x4xbf16, #tpu.memory_space<vmem>>, vector<1x4x4xbf16>
    %175 = vector.shape_cast %174 : vector<1x4x4xbf16> to vector<4x4xbf16>
    %cst_117 = arith.constant dense<0.000000e+00> : vector<4x256xf32>
    %176 = tpu.matmul %175, %51, %cst_117 {dimension_numbers = #tpu.dot_dimension_numbers<[1], [0], [0], [1], [0, 0, 1, 1], [], []>} : vector<4x4xbf16>, vector<4x256xbf16>, vector<4x256xf32> -> vector<4x256xf32>
    %177 = arith.addf %173, %176 : vector<4x256xf32>
    %c25 = arith.constant 25 : index
    %c0_118 = arith.constant 0 : index
    %c0_119 = arith.constant 0 : index
    %178 = vector.load %arg3[%c25, %c0_118, %c0_119] : memref<36x4x4xbf16, #tpu.memory_space<vmem>>, vector<1x4x4xbf16>
    %179 = vector.shape_cast %178 : vector<1x4x4xbf16> to vector<4x4xbf16>
    %cst_120 = arith.constant dense<0.000000e+00> : vector<4x256xf32>
    %180 = tpu.matmul %179, %54, %cst_120 {dimension_numbers = #tpu.dot_dimension_numbers<[1], [0], [0], [1], [0, 0, 1, 1], [], []>} : vector<4x4xbf16>, vector<4x256xbf16>, vector<4x256xf32> -> vector<4x256xf32>
    %181 = arith.addf %177, %180 : vector<4x256xf32>
    %c26 = arith.constant 26 : index
    %c0_121 = arith.constant 0 : index
    %c0_122 = arith.constant 0 : index
    %182 = vector.load %arg3[%c26, %c0_121, %c0_122] : memref<36x4x4xbf16, #tpu.memory_space<vmem>>, vector<1x4x4xbf16>
    %183 = vector.shape_cast %182 : vector<1x4x4xbf16> to vector<4x4xbf16>
    %cst_123 = arith.constant dense<0.000000e+00> : vector<4x256xf32>
    %184 = tpu.matmul %183, %61, %cst_123 {dimension_numbers = #tpu.dot_dimension_numbers<[1], [0], [0], [1], [0, 0, 1, 1], [], []>} : vector<4x4xbf16>, vector<4x256xbf16>, vector<4x256xf32> -> vector<4x256xf32>
    %185 = arith.addf %181, %184 : vector<4x256xf32>
    %186 = arith.maximumf %144, %185 : vector<4x256xf32>
    %cst_124 = arith.constant 0.000000e+00 : f32
    %187 = vector.broadcast %cst_124 : f32 to vector<4x256xf32>
    %c3_125 = arith.constant 3 : index
    %c0_126 = arith.constant 0 : index
    %c0_127 = arith.constant 0 : index
    %188 = vector.load %arg4[%c3_125, %c0_126, %c0_127] : memref<4x4x1xf32, #tpu.memory_space<vmem>>, vector<1x4x1xf32>
    %189 = vector.shape_cast %188 : vector<1x4x1xf32> to vector<4x1xf32>
    %190 = vector.broadcast %189 : vector<4x1xf32> to vector<4x256xf32>
    %191 = arith.addf %187, %190 : vector<4x256xf32>
    %c27 = arith.constant 27 : index
    %c0_128 = arith.constant 0 : index
    %c0_129 = arith.constant 0 : index
    %192 = vector.load %arg3[%c27, %c0_128, %c0_129] : memref<36x4x4xbf16, #tpu.memory_space<vmem>>, vector<1x4x4xbf16>
    %193 = vector.shape_cast %192 : vector<1x4x4xbf16> to vector<4x4xbf16>
    %cst_130 = arith.constant dense<0.000000e+00> : vector<4x256xf32>
    %194 = tpu.matmul %193, %17, %cst_130 {dimension_numbers = #tpu.dot_dimension_numbers<[1], [0], [0], [1], [0, 0, 1, 1], [], []>} : vector<4x4xbf16>, vector<4x256xbf16>, vector<4x256xf32> -> vector<4x256xf32>
    %195 = arith.addf %191, %194 : vector<4x256xf32>
    %c28 = arith.constant 28 : index
    %c0_131 = arith.constant 0 : index
    %c0_132 = arith.constant 0 : index
    %196 = vector.load %arg3[%c28, %c0_131, %c0_132] : memref<36x4x4xbf16, #tpu.memory_space<vmem>>, vector<1x4x4xbf16>
    %197 = vector.shape_cast %196 : vector<1x4x4xbf16> to vector<4x4xbf16>
    %cst_133 = arith.constant dense<0.000000e+00> : vector<4x256xf32>
    %198 = tpu.matmul %197, %20, %cst_133 {dimension_numbers = #tpu.dot_dimension_numbers<[1], [0], [0], [1], [0, 0, 1, 1], [], []>} : vector<4x4xbf16>, vector<4x256xbf16>, vector<4x256xf32> -> vector<4x256xf32>
    %199 = arith.addf %195, %198 : vector<4x256xf32>
    %c29 = arith.constant 29 : index
    %c0_134 = arith.constant 0 : index
    %c0_135 = arith.constant 0 : index
    %200 = vector.load %arg3[%c29, %c0_134, %c0_135] : memref<36x4x4xbf16, #tpu.memory_space<vmem>>, vector<1x4x4xbf16>
    %201 = vector.shape_cast %200 : vector<1x4x4xbf16> to vector<4x4xbf16>
    %cst_136 = arith.constant dense<0.000000e+00> : vector<4x256xf32>
    %202 = tpu.matmul %201, %27, %cst_136 {dimension_numbers = #tpu.dot_dimension_numbers<[1], [0], [0], [1], [0, 0, 1, 1], [], []>} : vector<4x4xbf16>, vector<4x256xbf16>, vector<4x256xf32> -> vector<4x256xf32>
    %203 = arith.addf %199, %202 : vector<4x256xf32>
    %c30 = arith.constant 30 : index
    %c0_137 = arith.constant 0 : index
    %c0_138 = arith.constant 0 : index
    %204 = vector.load %arg3[%c30, %c0_137, %c0_138] : memref<36x4x4xbf16, #tpu.memory_space<vmem>>, vector<1x4x4xbf16>
    %205 = vector.shape_cast %204 : vector<1x4x4xbf16> to vector<4x4xbf16>
    %cst_139 = arith.constant dense<0.000000e+00> : vector<4x256xf32>
    %206 = tpu.matmul %205, %34, %cst_139 {dimension_numbers = #tpu.dot_dimension_numbers<[1], [0], [0], [1], [0, 0, 1, 1], [], []>} : vector<4x4xbf16>, vector<4x256xbf16>, vector<4x256xf32> -> vector<4x256xf32>
    %207 = arith.addf %203, %206 : vector<4x256xf32>
    %c31 = arith.constant 31 : index
    %c0_140 = arith.constant 0 : index
    %c0_141 = arith.constant 0 : index
    %208 = vector.load %arg3[%c31, %c0_140, %c0_141] : memref<36x4x4xbf16, #tpu.memory_space<vmem>>, vector<1x4x4xbf16>
    %209 = vector.shape_cast %208 : vector<1x4x4xbf16> to vector<4x4xbf16>
    %cst_142 = arith.constant dense<0.000000e+00> : vector<4x256xf32>
    %210 = tpu.matmul %209, %37, %cst_142 {dimension_numbers = #tpu.dot_dimension_numbers<[1], [0], [0], [1], [0, 0, 1, 1], [], []>} : vector<4x4xbf16>, vector<4x256xbf16>, vector<4x256xf32> -> vector<4x256xf32>
    %211 = arith.addf %207, %210 : vector<4x256xf32>
    %c32_143 = arith.constant 32 : index
    %c0_144 = arith.constant 0 : index
    %c0_145 = arith.constant 0 : index
    %212 = vector.load %arg3[%c32_143, %c0_144, %c0_145] : memref<36x4x4xbf16, #tpu.memory_space<vmem>>, vector<1x4x4xbf16>
    %213 = vector.shape_cast %212 : vector<1x4x4xbf16> to vector<4x4xbf16>
    %cst_146 = arith.constant dense<0.000000e+00> : vector<4x256xf32>
    %214 = tpu.matmul %213, %44, %cst_146 {dimension_numbers = #tpu.dot_dimension_numbers<[1], [0], [0], [1], [0, 0, 1, 1], [], []>} : vector<4x4xbf16>, vector<4x256xbf16>, vector<4x256xf32> -> vector<4x256xf32>
    %215 = arith.addf %211, %214 : vector<4x256xf32>
    %c33_147 = arith.constant 33 : index
    %c0_148 = arith.constant 0 : index
    %c0_149 = arith.constant 0 : index
    %216 = vector.load %arg3[%c33_147, %c0_148, %c0_149] : memref<36x4x4xbf16, #tpu.memory_space<vmem>>, vector<1x4x4xbf16>
    %217 = vector.shape_cast %216 : vector<1x4x4xbf16> to vector<4x4xbf16>
    %cst_150 = arith.constant dense<0.000000e+00> : vector<4x256xf32>
    %218 = tpu.matmul %217, %51, %cst_150 {dimension_numbers = #tpu.dot_dimension_numbers<[1], [0], [0], [1], [0, 0, 1, 1], [], []>} : vector<4x4xbf16>, vector<4x256xbf16>, vector<4x256xf32> -> vector<4x256xf32>
    %219 = arith.addf %215, %218 : vector<4x256xf32>
    %c34_151 = arith.constant 34 : index
    %c0_152 = arith.constant 0 : index
    %c0_153 = arith.constant 0 : index
    %220 = vector.load %arg3[%c34_151, %c0_152, %c0_153] : memref<36x4x4xbf16, #tpu.memory_space<vmem>>, vector<1x4x4xbf16>
    %221 = vector.shape_cast %220 : vector<1x4x4xbf16> to vector<4x4xbf16>
    %cst_154 = arith.constant dense<0.000000e+00> : vector<4x256xf32>
    %222 = tpu.matmul %221, %54, %cst_154 {dimension_numbers = #tpu.dot_dimension_numbers<[1], [0], [0], [1], [0, 0, 1, 1], [], []>} : vector<4x4xbf16>, vector<4x256xbf16>, vector<4x256xf32> -> vector<4x256xf32>
    %223 = arith.addf %219, %222 : vector<4x256xf32>
    %c35 = arith.constant 35 : index
    %c0_155 = arith.constant 0 : index
    %c0_156 = arith.constant 0 : index
    %224 = vector.load %arg3[%c35, %c0_155, %c0_156] : memref<36x4x4xbf16, #tpu.memory_space<vmem>>, vector<1x4x4xbf16>
    %225 = vector.shape_cast %224 : vector<1x4x4xbf16> to vector<4x4xbf16>
    %cst_157 = arith.constant dense<0.000000e+00> : vector<4x256xf32>
    %226 = tpu.matmul %225, %61, %cst_157 {dimension_numbers = #tpu.dot_dimension_numbers<[1], [0], [0], [1], [0, 0, 1, 1], [], []>} : vector<4x4xbf16>, vector<4x256xbf16>, vector<4x256xf32> -> vector<4x256xf32>
    %227 = arith.addf %223, %226 : vector<4x256xf32>
    %228 = arith.maximumf %186, %227 : vector<4x256xf32>
    %cst_158 = arith.constant dense<0.000000e+00> : vector<4xf32>
    %229 = vector.multi_reduction <add>, %228, %cst_158 [1] : vector<4x256xf32> to vector<4xf32>
    %230 = vector.shape_cast %229 : vector<4xf32> to vector<4x1xf32>
    %cst_159 = arith.constant 2.560000e+02 : f32
    %231 = vector.broadcast %cst_159 : f32 to vector<4x1xf32>
    %232 = arith.divf %230, %231 : vector<4x1xf32>
    %233 = vector.broadcast %232 : vector<4x1xf32> to vector<4x256xf32>
    %234 = arith.subf %228, %233 : vector<4x256xf32>
    %235 = arith.mulf %234, %234 : vector<4x256xf32>
    %cst_160 = arith.constant dense<0.000000e+00> : vector<4xf32>
    %236 = vector.multi_reduction <add>, %235, %cst_160 [1] : vector<4x256xf32> to vector<4xf32>
    %237 = vector.shape_cast %236 : vector<4xf32> to vector<4x1xf32>
    %cst_161 = arith.constant 2.560000e+02 : f32
    %238 = vector.broadcast %cst_161 : f32 to vector<4x1xf32>
    %239 = arith.divf %237, %238 : vector<4x1xf32>
    %240 = vector.broadcast %232 : vector<4x1xf32> to vector<4x256xf32>
    %241 = arith.subf %228, %240 : vector<4x256xf32>
    %cst_162 = arith.constant 9.99999974E-6 : f32
    %242 = vector.broadcast %cst_162 : f32 to vector<4x1xf32>
    %243 = arith.addf %239, %242 : vector<4x1xf32>
    %244 = math.rsqrt %243 : vector<4x1xf32>
    %245 = vector.broadcast %244 : vector<4x1xf32> to vector<4x256xf32>
    %246 = arith.mulf %241, %245 : vector<4x256xf32>
    %c0_163 = arith.constant 0 : index
    %c0_164 = arith.constant 0 : index
    %247 = vector.load %arg5[%c0_163, %c0_164] : memref<4x1xf32, #tpu.memory_space<vmem>>, vector<4x1xf32>
    %248 = vector.broadcast %247 : vector<4x1xf32> to vector<4x256xf32>
    %249 = arith.mulf %246, %248 : vector<4x256xf32>
    %c0_165 = arith.constant 0 : index
    %c0_166 = arith.constant 0 : index
    %250 = vector.load %arg6[%c0_165, %c0_166] : memref<4x1xf32, #tpu.memory_space<vmem>>, vector<4x1xf32>
    %251 = vector.broadcast %250 : vector<4x1xf32> to vector<4x256xf32>
    %252 = arith.addf %249, %251 : vector<4x256xf32>
    %c0_167 = arith.constant 0 : index
    %c0_168 = arith.constant 0 : index
    %c17_169 = arith.constant 17 : index
    %253 = vector.load %arg1[%c0_167, %c0_168, %c17_169] : memref<1x4x290xf32, #tpu.memory_space<vmem>>, vector<1x4x256xf32>
    %254 = vector.shape_cast %253 : vector<1x4x256xf32> to vector<4x256xf32>
    %255 = arith.addf %252, %254 : vector<4x256xf32>
    %c0_170 = arith.constant 0 : index
    %c0_171 = arith.constant 0 : index
    %c0_172 = arith.constant 0 : index
    %256 = vector.load %arg7[%c0_170, %c0_171, %c0_172] : memref<1x4x256xf32, #tpu.memory_space<vmem>>, vector<1x4x256xf32>
    %257 = vector.shape_cast %256 : vector<1x4x256xf32> to vector<4x256xf32>
    %258 = vector.shape_cast %255 : vector<4x256xf32> to vector<1x4x256xf32>
    tpu.vector_store %arg7[%c0_170, %c0_171, %c0_172], %258 {strides = array<i32>} : memref<1x4x256xf32, #tpu.memory_space<vmem>>, vector<1x4x256xf32>,
    return
  }
  func.func @transform_0(%arg0: i32) -> (i32, i32, i32) {
    %c0_i32 = arith.constant 0 : i32
    %c0_i32_0 = arith.constant 0 : i32
    %c0_i32_1 = arith.constant 0 : i32
    return %arg0, %c0_i32, %c0_i32_0 : i32, i32, i32
  }
  func.func @transform_1(%arg0: i32) -> (i32, i32) {
    %c0_i32 = arith.constant 0 : i32
    %c0_i32_0 = arith.constant 0 : i32
    %c0_i32_1 = arith.constant 0 : i32
    return %c0_i32, %c0_i32_0 : i32, i32
  }
  func.func @transform_2(%arg0: i32) -> (i32, i32, i32) {
    %c0_i32 = arith.constant 0 : i32
    %c0_i32_0 = arith.constant 0 : i32
    %c0_i32_1 = arith.constant 0 : i32
    %c0_i32_2 = arith.constant 0 : i32
    return %c0_i32, %c0_i32_0, %c0_i32_1 : i32, i32, i32
  }
  func.func @transform_3(%arg0: i32) -> (i32, i32, i32) {
    %c0_i32 = arith.constant 0 : i32
    %c0_i32_0 = arith.constant 0 : i32
    %c0_i32_1 = arith.constant 0 : i32
    %c0_i32_2 = arith.constant 0 : i32
    return %c0_i32, %c0_i32_0, %c0_i32_1 : i32, i32, i32
  }
  func.func @transform_4(%arg0: i32) -> (i32, i32) {
    %c0_i32 = arith.constant 0 : i32
    %c0_i32_0 = arith.constant 0 : i32
    %c0_i32_1 = arith.constant 0 : i32
    return %c0_i32, %c0_i32_0 : i32, i32
  }
  func.func @transform_5(%arg0: i32) -> (i32, i32) {
    %c0_i32 = arith.constant 0 : i32
    %c0_i32_0 = arith.constant 0 : i32
    %c0_i32_1 = arith.constant 0 : i32
    return %c0_i32, %c0_i32_0 : i32, i32
  }
  func.func @transform_6(%arg0: i32) -> (i32, i32, i32) {
    %c0_i32 = arith.constant 0 : i32
    %c0_i32_0 = arith.constant 0 : i32
    %c0_i32_1 = arith.constant 0 : i32
    return %arg0, %c0_i32, %c0_i32_0 : i32, i32, i32
  }
}

</mosaic_0001>

<bundles_post_ra>
// kernel: resnet_block_forward.1
= control target key start
LH: loop header
LB: loop body
LE: loop exit
PB: predicated region body
PF: predicated region fallthrough
CT: control target
= control target key end

     0   :  { %s2688_s21 = smov 0   ;;  %s3149_s0 = inlined_call_operand.vmem [shape: f32[2,4,290], index: 0, kind: input, shape index: {}]   ;;  %s3150_s1 = inlined_call_operand.vmem [shape: s32[1,256], index: 1, kind: input, shape index: {}]   ;;  %s3151_s2 = inlined_call_operand.vmem [shape: bf16[36,4,4], index: 2, kind: input, shape index: {}]   ;;  %s3152_s3 = inlined_call_operand.vmem [shape: f32[4,4,1], index: 3, kind: input, shape index: {}]   ;;  %s3153_s4 = inlined_call_operand.vmem [shape: f32[4,1], index: 4, kind: input, shape index: {}]   ;;  %s3154_s5 = inlined_call_operand.vmem [shape: f32[4,1], index: 5, kind: input, shape index: {}]   ;;  %s3155_s6 = inlined_call_operand.vmem [shape: f32[2,4,256], index: 6, kind: output, shape index: {}]  }
   0x1 LB: > { %s2331_s22 = sadd.s32 4294967295, %s2642_s21   ;;  %p2335_p0 = scmp.ge.s32.totalorder %s2642_s21, 1  ;;  %s2642_s21 = sphi %s2688_s21, %s16_s21  }
   0x2   : > { %p212_p1 = scmp.lt.s32.totalorder %s2642_s21, 3 }
   0x4   : > { %p213_p2 = pnand %p2335_p0, %p212_p1 }
   0x5   : > { %p242_p3 = scmp.lt.s32.totalorder (!%p213_p2), %s2331_s22, 1  ;;  %v253_v0 = vld [vmem:[%s3150_s1] sm:$0x3] (!%p213_p2)  ;;  %v262_v1 = vlaneseq (!%p213_p2)  ;;  %v2644_v2 = vmov (!%p213_p2), 0   ;;  %s2645_s29 = smov (!%p213_p2), 127   ;;  %vm382_vm8 = vcmask (!%p213_p2), 1041408  }
   0x6   : > { %216 = sbr.rel (%p213_p2) target bundleno = 873 (0x369), region = 44  ;;  %vm254_vm0 = vcmp.ge.s32.totalorder (!%p213_p2), %v253_v0, 1  ;;  %vm255_vm1 = vcmp.lt.s32.totalorder (!%p213_p2), %v253_v0, 16  ;;  %421 = vmatprep.mubr.bf16.mxu0 (!%p213_p2), %v2644_v2  ;;  %939 = vmatprep.mubr.bf16.mxu1 (!%p213_p2), %v2644_v2  ;;  %vm257_vm3 = vcmp.ge.s32.totalorder (!%p213_p2), %v253_v0, 0  ;;  %vm258_vm4 = vcmp.lt.s32.totalorder (!%p213_p2), %v253_v0, 15  ;;  %s2646_s30 = smov (!%p213_p2), 126  }
   0x7   : > { %vm256_vm2 = vmand (!%p213_p2), %vm254_vm0, %vm255_vm1  ;;  %v263_v3 = vshrl.u32 (!%p213_p2), %v262_v1, 7  ;;  %2632 = vset.pattern.permute.xlu0 (!%p213_p2), %v2644_v2  ;;  %2631 = vset.pattern.permute.xlu1 (!%p213_p2), %v2644_v2  ;;  %v377_v24 = vld [vmem:[%s3151_s2] sm:$0x3] (!%p213_p2)  ;;  %vm378_vm9 = vcmask (!%p213_p2), 31744   ;;  %v2366_v25 = vld [vmem:[%s3151_s2 + $0x12] sm:$0x3] (!%p213_p2) }
   0x8   : > { %v261_v4 = vsel (!%p213_p2), %vm256_vm2, 1, %v2644_v2  ;;  %vm259_vm5 = vmand (!%p213_p2), %vm257_vm3, %vm258_vm4  ;;  %s2647_s11 = smov (!%p213_p2), 112   ;;  %s2648_s12 = smov (!%p213_p2), 111   ;;  %vm443_vm10 = vcmask (!%p213_p2), 1039360   ;;  %vm301_vm11 = vcmask (!%p213_p2), 1031168   ;;  %vm316_vm14 = vcmask (!%p213_p2), 916480  }
   0x9   : > { %v268_v5 = vsub.s32 (!%p213_p2), 1, %v263_v3  ;;  %v264_v6 = vsub.s32 (!%p213_p2), 0, %v263_v3  ;;  %v283_v11 = vsel (!%p213_p2), %vm259_vm5, 1, %v2644_v2  ;;  %s2649_s13 = smov (!%p213_p2), 110   ;;  %s2650_s14 = smov (!%p213_p2), 96   ;;  %vm614_vm15 = vcmask (!%p213_p2), 908288  }
   0xa   : > { %s2651_s15 = smov (!%p213_p2), 95   ;;  %s2652_s16 = smov (!%p213_p2), 94   ;;  %v2341_v35 = vld [vmem:[%s3151_s2 + $0x2] sm:$0x3] (!%p213_p2)  ;;  %v2369_v36 = vld [vmem:[%s3151_s2 + $0x14] sm:$0x3] (!%p213_p2) }
   0xb   : > { %v2710_v7 = vrot.slane (!%p213_p2), %v261_v4, %v268_v5  ;;  %v2712_v8 = vrot.slane (!%p213_p2), %v261_v4, %v264_v6  ;;  %v2729_v15 = vrot.slane (!%p213_p2), %v283_v11, %v264_v6  ;;  %v2731_v16 = vrot.slane (!%p213_p2), %v283_v11, %v268_v5  ;;  %v2344_v57 = vld [vmem:[%s3151_s2 + $0x4] sm:$0x3] (!%p213_p2)  ;;  %v2372_v58 = vld [vmem:[%s3151_s2 + $0x16] sm:$0x3] (!%p213_p2)  ;;  %v2347_v6 = vld [vmem:[%s3151_s2 + $0x6] sm:$0x3] (!%p213_p2) }
   0xc   : > { %vm331_vm0 = vcmask (!%p213_p2), 900096   ;;  %v2375_v11 = vld [vmem:[%s3151_s2 + $0x18] sm:$0x3] (!%p213_p2)  ;;  %vm346_vm1 = vcmask (!%p213_p2), 785408   ;;  %vm785_vm2 = vcmask (!%p213_p2), 777216   ;;  %vm361_vm3 = vcmask (!%p213_p2), 769024  }
   0xd   : > { %s3157_s22 = smov (!%p242_p3, %s2331_s22), 1  ;;  %vm271_vm6 = vcmp.eq.s32.totalorder %v2710_v7, 1  ;;  %vm270_vm7 = vcmp.eq.s32.totalorder %v2712_v8, 1  ;;  %vm292_vm12 = vcmp.eq.s32.totalorder %v2729_v15, 1  ;;  %vm293_vm13 = vcmp.eq.s32.totalorder %v2731_v16, 1 }
   0xe   : > { %s2588_s25 = smul.u32 12, %s3157_s22  ;;  %v370_v7 = vld [vmem:[%s3152_s3] sm:$0xf]  ;;  %v2393_v16 = vld [vmem:[%s3152_s3 + $0x8] sm:$0xf]  ;;  %vm2220_vm4 = vcmask 1043456  }
   0xf   : > { %v2250_v15 = vld [vmem:[%s3154_s5] sm:$0xf] }
  0x10   : > { %s246_s28 = scalar_lea.vmem %s3149_s0, %s2588_s25 }
  0x11   : > { %v2714_v9 = vld [vmem:[%s246_s28] sm:$0xff]  ;;  %v2716_v10 = vld [vmem:[%s246_s28 + $0x8] sm:$0xf] }
  0x12   : > { %v280_v12 = vpack.c.bf16 %v2714_v9, %v2714_v9  ;;  %v282_v13 = vpack.c.bf16 %v2716_v10, %v2716_v10  ;;  %v2725_v14 = vcombine.high %v2714_v9, %v2714_v9  ;;  %v275_v21 = vsel %vm270_vm7, %v2714_v9, 0.0 }
  0x13   : > { %v277_v22 = vpack.c.bf16 %v275_v21, %v275_v21 }
  0x14   : > { %437 = vrot.lane.b32.xlu0 %v280_v12, %s2645_s29  ;;  %441 = vrot.lane.b32.xlu1 %v282_v13, %s2645_s29  ;;  %v281_v17 = vpack.c.bf16 %v2725_v14, %v2725_v14  ;;  %v2606_v18 = vpack.i.bf16 %v2725_v14, %v2714_v9  ;;  %v276_v19 = vsel %vm271_vm6, %v2725_v14, 0.0 }
  0x15   : > { %v2740_v20 = vpack.c.bf16 %v276_v19, %v276_v19  ;;  %v2750_v23 = vsel %vm382_vm8, %v277_v22, 0 }
  0x17   : > { %2339 = vmatprep.subr.msk.bf16.mxu0 %vm382_vm8, %v2740_v20  ;;  %2367 = vmatprep.subr.msk.bf16.mxu1 %vm382_vm8, %v2740_v20 }
  0x18   : > { %439 = vrot.lane.b32.xlu0 %v281_v17, %s2645_s29  ;;  %2607 = vrot.lane.b32.xlu1 %v2606_v18, %s2646_s30 }
  0x19   : > { %390 = vmatpush1.bf16.msra.mxu0 %v2750_v23  ;;  %908 = vmatpush1.bf16.msra.mxu1 %v2750_v23 }
  0x1c   : > { %299 = vrot.lane.b32.xlu0 %v2716_v10, %s2646_s30  ;;  %2612 = vrot.lane.b32.xlu1 %v2606_v18, %s2647_s11 }
  0x1d   : > { %2340 = vmatmul.mubr.msk.bf16.vlgmr.msra.gmra.mrb[0].mxu0 %vm378_vm9, %v377_v24  ;;  %2368 = vmatmul.mubr.msk.bf16.vlgmr.msra.gmra.mrb[0].mxu1 %vm378_vm9, %v2366_v25 }
  0x1e   : > { %487 = vmatprep.mubr.bf16.mxu0 %v2644_v2  ;;  %987 = vmatprep.mubr.bf16.mxu1 %v2644_v2 }
  0x20   : > { %314 = vrot.lane.b32.xlu0 %v2716_v10, %s2647_s11  ;;  %608 = vrot.lane.b32.xlu1 %v280_v12, %s2648_s12 }
  0x24   : > { %612 = vrot.lane.b32.xlu1 %v282_v13, %s2648_s12  ;;  %610 = vrot.lane.b32.xlu0 %v281_v17, %s2648_s12 }
  0x28   : > { %2617 = vrot.lane.b32.xlu0 %v2606_v18, %s2649_s13  ;;  %329 = vrot.lane.b32.xlu1 %v2716_v10, %s2649_s13  ;;  %s2451_s13 = sshll.u32 %s3157_s22, 3 }
  0x2c   : > { %2622 = vrot.lane.b32.xlu0 %v2606_v18, %s2650_s14  ;;  %344 = vrot.lane.b32.xlu1 %v2716_v10, %s2650_s14 }
  0x30   : > { %779 = vrot.lane.b32.xlu0 %v280_v12, %s2651_s15  ;;  %781 = vrot.lane.b32.xlu1 %v281_v17, %s2651_s15 }
  0x34   : > { %783 = vrot.lane.b32.xlu0 %v282_v13, %s2651_s15  ;;  %2627 = vrot.lane.b32.xlu1 %v2606_v18, %s2652_s16  ;;  %s251_s15 = scalar_lea.vmem %s3155_s6, %s2451_s13 }
  0x38   : > { %359 = vrot.lane.b32.xlu0 %v2716_v10, %s2652_s16  ;;  %373 = vperm.xlu1 %2631, %v370_v7  }
  0x3c   : > { %1340 = vperm.xlu1 %2631, %v2393_v16  }
  0x86   : > { %v438_v26 = vpop.permute.xlu0 %437  ;;  %v442_v27 = vpop.permute.xlu1 %441 }
  0x8a   : > { %v440_v28 = vpop.permute.xlu0 %439  ;;  %v2608_v29 = vpop.permute.xlu1 %2607 }
  0x8b   : > { %v444_v30 = vsel %vm443_vm10, %v438_v26, %v440_v28  ;;  %v2773_v31 = vsel %vm443_vm10, %v440_v28, %v442_v27  ;;  %v2610_v32 = vunpack.i.h.bf16 %v2608_v29  ;;  %v2609_v33 = vunpack.i.l.bf16 %v2608_v29  ;;  %v2350_v28 = vld [vmem:[%s3151_s2 + $0x8] sm:$0x3]  ;;  %v2378_v29 = vld [vmem:[%s3151_s2 + $0x1a] sm:$0x3] }
  0x8c   : > { %v2776_v34 = vsel %vm382_vm8, %v444_v30, 0  ;;  %2342 = vmatprep.subr.msk.bf16.mxu0 %vm382_vm8, %v2773_v31  ;;  %2370 = vmatprep.subr.msk.bf16.mxu1 %vm382_vm8, %v2773_v31 }
  0x8d   : > { %456 = vmatpush1.bf16.msra.mxu0 %v2776_v34  ;;  %956 = vmatpush1.bf16.msra.mxu1 %v2776_v34  ;;  %v302_v37 = vsel %vm301_vm11, %v2609_v33, %v2610_v32 }
  0x8e   : > { %v300_v38 = vpop.permute.xlu0 %299  ;;  %v306_v39 = vsel %vm292_vm12, %v302_v37, 0.0  ;;  %v2613_v40 = vpop.permute.xlu1 %2612 }
  0x8f   : > { %v303_v41 = vsel %vm301_vm11, %v2610_v32, %v300_v38  ;;  %v308_v42 = vpack.c.bf16 %v306_v39, %v306_v39  ;;  %v2615_v43 = vunpack.i.h.bf16 %v2613_v40  ;;  %v2614_v44 = vunpack.i.l.bf16 %v2613_v40  ;;  %v2353_v40 = vld [vmem:[%s3151_s2 + $0xa] sm:$0x3] }
  0x90   : > { %2343 = vmatmul.mubr.msk.bf16.vlgmr.msra.gmra.mrb[0].mxu0 %vm378_vm9, %v2341_v35  ;;  %2371 = vmatmul.mubr.msk.bf16.vlgmr.msra.gmra.mrb[0].mxu1 %vm378_vm9, %v2369_v36  ;;  %v307_v45 = vsel %vm293_vm13, %v303_v41, 0.0  ;;  %v2365_v35 = vld [vmem:[%s3152_s3 + $0x4] sm:$0xf]  ;;  %v2381_v41 = vld [vmem:[%s3151_s2 + $0x1c] sm:$0x3] }
  0x91   : > { %v2799_v46 = vpack.c.bf16 %v307_v45, %v307_v45  ;;  %v2802_v47 = vsel %vm382_vm8, %v308_v42, 0  ;;  %541 = vmatprep.mubr.bf16.mxu0 %v2644_v2  ;;  %1035 = vmatprep.mubr.bf16.mxu1 %v2644_v2  ;;  %v317_v48 = vsel %vm316_vm14, %v2614_v44, %v2615_v43 }
  0x92   : > { %v315_v49 = vpop.permute.xlu0 %314  ;;  %v321_v51 = vsel %vm270_vm7, %v317_v48, 0.0  ;;  %v609_v52 = vpop.permute.xlu1 %608  ;;  %898 = vperm.xlu0 %2632, %v2365_v35  }
  0x93   : > { %2345 = vmatprep.subr.msk.bf16.mxu0 %vm382_vm8, %v2799_v46  ;;  %2373 = vmatprep.subr.msk.bf16.mxu1 %vm382_vm8, %v2799_v46  ;;  %v318_v50 = vsel %vm316_vm14, %v2615_v43, %v315_v49  ;;  %v323_v55 = vpack.c.bf16 %v321_v51, %v321_v51 }
  0x94   : > { %510 = vmatpush1.bf16.msra.mxu0 %v2802_v47  ;;  %1004 = vmatpush1.bf16.msra.mxu1 %v2802_v47  ;;  %v322_v53 = vsel %vm271_vm6, %v318_v50, 0.0 }
  0x95   : > { %v2818_v54 = vpack.c.bf16 %v322_v53, %v322_v53  ;;  %v2831_v60 = vsel %vm382_vm8, %v323_v55, 0  ;;  %v2356_v53 = vld [vmem:[%s3151_s2 + $0xc] sm:$0x3]  ;;  %v2384_v55 = vld [vmem:[%s3151_s2 + $0x1e] sm:$0x3] }
  0x96   : > { %v611_v56 = vpop.permute.xlu0 %610  ;;  %v613_v59 = vpop.permute.xlu1 %612 }
  0x97   : > { %2348 = vmatprep.subr.msk.bf16.mxu0 %vm382_vm8, %v2818_v54  ;;  %2376 = vmatprep.subr.msk.bf16.mxu1 %vm382_vm8, %v2818_v54  ;;  %v2836_v62 = vsel %vm614_vm15, %v611_v56, %v613_v59  ;;  %v615_v3 = vsel %vm614_vm15, %v609_v52, %v611_v56 }
  0x98   : > { %v2856_v12 = vsel %vm382_vm8, %v615_v3, 0 }
  0x9a   : > { %v2618_v61 = vpop.permute.xlu0 %2617  ;;  %v330_v0 = vpop.permute.xlu1 %329 }
  0x9b   : > { %v2620_v63 = vunpack.i.h.bf16 %v2618_v61  ;;  %v2619_v4 = vunpack.i.l.bf16 %v2618_v61  ;;  %v2421_v61 = vld [vmem:[%s3152_s3 + $0xc] sm:$0xf] }
  0x9c   : > { %2346 = vmatmul.mubr.msk.bf16.vlgmr.msra.gmra.mrb[0].mxu0 %vm378_vm9, %v2344_v57  ;;  %2374 = vmatmul.mubr.msk.bf16.vlgmr.msra.gmra.mrb[0].mxu1 %vm378_vm9, %v2372_v58 }
  0x9d   : > { %564 = vmatpush1.bf16.msra.mxu0 %v2831_v60  ;;  %1052 = vmatpush1.bf16.msra.mxu1 %v2831_v60  ;;  %v333_v1 = vsel %vm331_vm0, %v2620_v63, %v330_v0  ;;  %v332_v18 = vsel %vm331_vm0, %v2619_v4, %v2620_v63  ;;  %v2359_v0 = vld [vmem:[%s3151_s2 + $0xe] sm:$0x3]  ;;  %v2362_v4 = vld [vmem:[%s3151_s2 + $0x10] sm:$0x3] }
  0x9e   : > { %595 = vmatprep.mubr.bf16.mxu0 %v2644_v2  ;;  %1083 = vmatprep.mubr.bf16.mxu1 %v2644_v2  ;;  %v337_v5 = vsel %vm293_vm13, %v333_v1, 0.0  ;;  %v2623_v13 = vpop.permute.xlu0 %2622  ;;  %v345_v21 = vpop.permute.xlu1 %344  ;;  %v336_v22 = vsel %vm292_vm12, %v332_v18, 0.0  ;;  %v2387_v1 = vld [vmem:[%s3151_s2 + $0x20] sm:$0x3]  ;;  %v2415_v18 = vld [vmem:[%s3151_s2 + $0x32] sm:$0x3] }
  0x9f   : > { %2351 = vmatprep.subr.msk.bf16.mxu0 %vm382_vm8, %v2836_v62  ;;  %2379 = vmatprep.subr.msk.bf16.mxu1 %vm382_vm8, %v2836_v62  ;;  %v2858_v17 = vpack.c.bf16 %v337_v5, %v337_v5  ;;  %v2625_v19 = vunpack.i.h.bf16 %v2623_v13  ;;  %v338_v25 = vpack.c.bf16 %v336_v22, %v336_v22  ;;  %v2624_v26 = vunpack.i.l.bf16 %v2623_v13  ;;  %v2390_v5 = vld [vmem:[%s3151_s2 + $0x22] sm:$0x3]  ;;  %v2412_v13 = vld [vmem:[%s3151_s2 + $0x30] sm:$0x3]  ;;  %v2446_v22 = vld [vmem:[%s3151_s2 + $0x46] sm:$0x3] }
  0xa0   : > { %1782 = vperm.xlu1 %2631, %v2421_v61  }
  0xa1   : > { %v348_v24 = vsel %vm346_vm1, %v2625_v19, %v345_v21  ;;  %v2881_v30 = vsel %vm382_vm8, %v338_v25, 0  ;;  %v347_v33 = vsel %vm346_vm1, %v2624_v26, %v2625_v19  ;;  %v2443_v19 = vld [vmem:[%s3151_s2 + $0x44] sm:$0x3]  ;;  %v2418_v21 = vld [vmem:[%s3151_s2 + $0x34] sm:$0x3] }
  0xa2   : > { %v352_v27 = vsel %vm271_vm6, %v348_v24, 0.0  ;;  %v351_v36 = vsel %vm270_vm7, %v347_v33, 0.0  ;;  %v780_v37 = vpop.permute.xlu0 %779  ;;  %v782_v39 = vpop.permute.xlu1 %781 }
  0xa3   : > { %v2883_v32 = vpack.c.bf16 %v352_v27, %v352_v27  ;;  %v353_v38 = vpack.c.bf16 %v351_v36, %v351_v36  ;;  %v786_v50 = vsel %vm785_vm2, %v780_v37, %v782_v39 }
  0xa4   : > { %v2935_v56 = vsel %vm382_vm8, %v786_v50, 0  ;;  %2253 = vperm.xlu1 %2631, %v2250_v15  }
  0xa5   : > { %v2910_v43 = vsel %vm382_vm8, %v353_v38, 0 }
  0xa6   : > { %v784_v42 = vpop.permute.xlu0 %783  ;;  %v2628_v8 = vpop.permute.xlu1 %2627 }
  0xa7   : > { %v2915_v44 = vsel %vm785_vm2, %v782_v39, %v784_v42  ;;  %v2630_v45 = vunpack.i.h.bf16 %v2628_v8  ;;  %v2629_v51 = vunpack.i.l.bf16 %v2628_v8 }
  0xa8   : > { %2349 = vmatmul.mubr.msk.bf16.vlgmr.msra.gmra.mrb[0].mxu0 %vm378_vm9, %v2347_v6  ;;  %2377 = vmatmul.mubr.msk.bf16.vlgmr.msra.gmra.mrb[0].mxu1 %vm378_vm9, %v2375_v11  ;;  %v2422_v6 = vld [vmem:[%s3151_s2 + $0x36] sm:$0x3]  ;;  %v2409_v11 = vld [vmem:[%s3151_s2 + $0x2e] sm:$0x3] }
  0xa9   : > { %627 = vmatpush1.bf16.msra.mxu0 %v2856_v12  ;;  %1100 = vmatpush1.bf16.msra.mxu1 %v2856_v12  ;;  %v362_v58 = vsel %vm361_vm3, %v2629_v51, %v2630_v45 }
  0xaa   : > { %658 = vmatprep.mubr.bf16.mxu0 %v2644_v2  ;;  %1131 = vmatprep.mubr.bf16.mxu1 %v2644_v2  ;;  %v360_v48 = vpop.permute.xlu0 %359  ;;  %v366_v59 = vsel %vm292_vm12, %v362_v58, 0.0 }
  0xab   : > { %2354 = vmatprep.subr.msk.bf16.mxu0 %vm382_vm8, %v2858_v17  ;;  %2382 = vmatprep.subr.msk.bf16.mxu1 %vm382_vm8, %v2858_v17  ;;  %v363_v49 = vsel %vm361_vm3, %v2630_v45, %v360_v48  ;;  %v368_v63 = vpack.c.bf16 %v366_v59, %v366_v59 }
  0xac   : > { %v367_v52 = vsel %vm293_vm13, %v363_v49, 0.0 }
  0xad   : > { %v2937_v57 = vpack.c.bf16 %v367_v52, %v367_v52  ;;  %v2964_v3 = vsel %vm382_vm8, %v368_v63, 0 }
  0xb4   : > { %2352 = vmatmul.mubr.msk.bf16.vlgmr.msra.gmra.mrb[0].mxu0 %vm378_vm9, %v2350_v28  ;;  %2380 = vmatmul.mubr.msk.bf16.vlgmr.msra.gmra.mrb[0].mxu1 %vm378_vm9, %v2378_v29 }
  0xb5   : > { %681 = vmatpush1.bf16.msra.mxu0 %v2881_v30  ;;  %1148 = vmatpush1.bf16.msra.mxu1 %v2881_v30 }
  0xb6   : > { %712 = vmatprep.mubr.bf16.mxu0 %v2644_v2  ;;  %1179 = vmatprep.mubr.bf16.mxu1 %v2644_v2 }
  0xb7   : > { %2357 = vmatprep.subr.msk.bf16.mxu0 %vm382_vm8, %v2883_v32  ;;  %2385 = vmatprep.subr.msk.bf16.mxu1 %vm382_vm8, %v2883_v32  ;;  %v374_v24 = vpop.permute.xlu1 %373 }
  0xc0   : > { %2355 = vmatmul.mubr.msk.bf16.vlgmr.msra.gmra.mrb[0].mxu0 %vm378_vm9, %v2353_v40  ;;  %2383 = vmatmul.mubr.msk.bf16.vlgmr.msra.gmra.mrb[0].mxu1 %vm378_vm9, %v2381_v41  ;;  %v1341_v40 = vpop.permute.xlu1 %1340 }
  0xc1   : > { %735 = vmatpush1.bf16.msra.mxu0 %v2910_v43  ;;  %1196 = vmatpush1.bf16.msra.mxu1 %v2910_v43 }
  0xc2   : > { %766 = vmatprep.mubr.bf16.mxu0 %v2644_v2  ;;  %1227 = vmatprep.mubr.bf16.mxu1 %v2644_v2 }
  0xc3   : > { %2360 = vmatprep.subr.msk.bf16.mxu0 %vm382_vm8, %v2915_v44  ;;  %2388 = vmatprep.subr.msk.bf16.mxu1 %vm382_vm8, %v2915_v44 }
  0xcc   : > { %2358 = vmatmul.mubr.msk.bf16.vlgmr.msra.gmra.mrb[0].mxu0 %vm378_vm9, %v2356_v53  ;;  %2386 = vmatmul.mubr.msk.bf16.vlgmr.msra.gmra.mrb[0].mxu1 %vm378_vm9, %v2384_v55 }
  0xcd   : > { %798 = vmatpush1.bf16.msra.mxu0 %v2935_v56  ;;  %1244 = vmatpush1.bf16.msra.mxu1 %v2935_v56 }
  0xce   : > { %829 = vmatprep.mubr.bf16.mxu0 %v2644_v2  ;;  %1275 = vmatprep.mubr.bf16.mxu1 %v2644_v2 }
  0xcf   : > { %2363 = vmatprep.subr.msk.bf16.mxu0 %vm382_vm8, %v2937_v57  ;;  %2391 = vmatprep.subr.msk.bf16.mxu1 %vm382_vm8, %v2937_v57 }
  0xd8   : > { %2361 = vmatmul.mubr.msk.bf16.vlgmr.msra.gmra.mrb[0].mxu0 %vm378_vm9, %v2359_v0  ;;  %2389 = vmatmul.mubr.msk.bf16.vlgmr.msra.gmra.mrb[0].mxu1 %vm378_vm9, %v2387_v1  ;;  %v2242_v0 = vld [vmem:[%s3153_s4] sm:$0xf] }
  0xd9   : > { %852 = vmatpush1.bf16.msra.mxu0 %v2964_v3  ;;  %1292 = vmatpush1.bf16.msra.mxu1 %v2964_v3 }
  0xda   : > { %883 = vmatprep.mubr.bf16.mxu0 %v2644_v2  ;;  %1323 = vmatprep.mubr.bf16.mxu1 %v2644_v2 }
  0xdb   : > { %2395 = vmatprep.subr.msk.bf16.mxu0 %vm382_vm8, %v2740_v20  ;;  %2423 = vmatprep.subr.msk.bf16.mxu1 %vm382_vm8, %v2740_v20  ;;  %v2394_v20 = vld [vmem:[%s3151_s2 + $0x24] sm:$0x3] }
  0xe4   : > { %2364 = vmatmul.mubr.msk.bf16.vlgmr.msra.gmra.mrb[0].mxu0 %vm378_vm9, %v2362_v4  ;;  %2392 = vmatmul.mubr.msk.bf16.vlgmr.msra.gmra.mrb[0].mxu1 %vm378_vm9, %v2390_v5 }
  0xe5   : > { %1350 = vmatpush1.bf16.msra.mxu0 %v2750_v23  ;;  %1792 = vmatpush1.bf16.msra.mxu1 %v2750_v23  ;;  %v2397_v23 = vld [vmem:[%s3151_s2 + $0x26] sm:$0x3] }
  0xe6   : > { %2398 = vmatprep.subr.msk.bf16.mxu0 %vm382_vm8, %v2773_v31  ;;  %2426 = vmatprep.subr.msk.bf16.mxu1 %vm382_vm8, %v2773_v31  ;;  %v2425_v31 = vld [vmem:[%s3151_s2 + $0x38] sm:$0x3] }
  0xe7   : > { %1381 = vmatprep.mubr.bf16.mxu0 %v2644_v2  ;;  %1823 = vmatprep.mubr.bf16.mxu1 %v2644_v2 }
  0xec   : > { %2396 = vmatmul.mubr.msk.bf16.vlgmr.msra.gmra.mrb[4].mxu0 %vm378_vm9, %v2394_v20  ;;  %2424 = vmatmul.mubr.msk.bf16.vlgmr.msra.gmra.mrb[4].mxu1 %vm378_vm9, %v2422_v6 }
  0xed   : > { %1398 = vmatpush1.bf16.msra.mxu0 %v2776_v34  ;;  %1840 = vmatpush1.bf16.msra.mxu1 %v2776_v34  ;;  %v2400_v34 = vld [vmem:[%s3151_s2 + $0x28] sm:$0x3] }
  0xee   : > { %2401 = vmatprep.subr.msk.bf16.mxu0 %vm382_vm8, %v2799_v46  ;;  %2429 = vmatprep.subr.msk.bf16.mxu1 %vm382_vm8, %v2799_v46  ;;  %v2428_v46 = vld [vmem:[%s3151_s2 + $0x3a] sm:$0x3] }
  0xef   : > { %1429 = vmatprep.mubr.bf16.mxu0 %v2644_v2  ;;  %1871 = vmatprep.mubr.bf16.mxu1 %v2644_v2 }
  0xf8   : > { %2399 = vmatmul.mubr.msk.bf16.vlgmr.msra.gmra.mrb[4].mxu0 %vm378_vm9, %v2397_v23  ;;  %2427 = vmatmul.mubr.msk.bf16.vlgmr.msra.gmra.mrb[4].mxu1 %vm378_vm9, %v2425_v31 }
  0xf9   : > { %1446 = vmatpush1.bf16.msra.mxu0 %v2802_v47  ;;  %1888 = vmatpush1.bf16.msra.mxu1 %v2802_v47  ;;  %v2403_v47 = vld [vmem:[%s3151_s2 + $0x2a] sm:$0x3] }
  0xfa   : > { %2404 = vmatprep.subr.msk.bf16.mxu0 %vm382_vm8, %v2818_v54  ;;  %2432 = vmatprep.subr.msk.bf16.mxu1 %vm382_vm8, %v2818_v54  ;;  %v2431_v54 = vld [vmem:[%s3151_s2 + $0x3c] sm:$0x3] }
  0xfb   : > { %1477 = vmatprep.mubr.bf16.mxu0 %v2644_v2  ;;  %1919 = vmatprep.mubr.bf16.mxu1 %v2644_v2 }
 0x104   : > { %2402 = vmatmul.mubr.msk.bf16.vlgmr.msra.gmra.mrb[4].mxu0 %vm378_vm9, %v2400_v34  ;;  %2430 = vmatmul.mubr.msk.bf16.vlgmr.msra.gmra.mrb[4].mxu1 %vm378_vm9, %v2428_v46 }
 0x105   : > { %1494 = vmatpush1.bf16.msra.mxu0 %v2831_v60  ;;  %1936 = vmatpush1.bf16.msra.mxu1 %v2831_v60  ;;  %v2406_v60 = vld [vmem:[%s3151_s2 + $0x2c] sm:$0x3] }
 0x106   : > { %2407 = vmatprep.subr.msk.bf16.mxu0 %vm382_vm8, %v2836_v62  ;;  %2435 = vmatprep.subr.msk.bf16.mxu1 %vm382_vm8, %v2836_v62  ;;  %v2434_v62 = vld [vmem:[%s3151_s2 + $0x3e] sm:$0x3] }
 0x107   : > { %1525 = vmatprep.mubr.bf16.mxu0 %v2644_v2  ;;  %1967 = vmatprep.mubr.bf16.mxu1 %v2644_v2 }
 0x110   : > { %2405 = vmatmul.mubr.msk.bf16.vlgmr.msra.gmra.mrb[4].mxu0 %vm378_vm9, %v2403_v47  ;;  %2433 = vmatmul.mubr.msk.bf16.vlgmr.msra.gmra.mrb[4].mxu1 %vm378_vm9, %v2431_v54 }
 0x111   : > { %1542 = vmatpush1.bf16.msra.mxu0 %v2856_v12  ;;  %1984 = vmatpush1.bf16.msra.mxu1 %v2856_v12  ;;  %v2437_v12 = vld [vmem:[%s3151_s2 + $0x40] sm:$0x3]  ;;  %v899_v25 = vpop.permute.xlu0 %898 }
 0x112   : > { %2410 = vmatprep.subr.msk.bf16.mxu0 %vm382_vm8, %v2858_v17  ;;  %2438 = vmatprep.subr.msk.bf16.mxu1 %vm382_vm8, %v2858_v17  ;;  %v2440_v17 = vld [vmem:[%s3151_s2 + $0x42] sm:$0x3] }
 0x113   : > { %1573 = vmatprep.mubr.bf16.mxu0 %v2644_v2  ;;  %2015 = vmatprep.mubr.bf16.mxu1 %v2644_v2 }
 0x11c   : > { %2408 = vmatmul.mubr.msk.bf16.vlgmr.msra.gmra.mrb[4].mxu0 %vm378_vm9, %v2406_v60  ;;  %2436 = vmatmul.mubr.msk.bf16.vlgmr.msra.gmra.mrb[4].mxu1 %vm378_vm9, %v2434_v62 }
 0x11d   : > { %1590 = vmatpush1.bf16.msra.mxu0 %v2881_v30  ;;  %2032 = vmatpush1.bf16.msra.mxu1 %v2881_v30 }
 0x11e   : > { %2413 = vmatprep.subr.msk.bf16.mxu0 %vm382_vm8, %v2883_v32  ;;  %2441 = vmatprep.subr.msk.bf16.mxu1 %vm382_vm8, %v2883_v32 }
 0x11f   : > { %1621 = vmatprep.mubr.bf16.mxu0 %v2644_v2  ;;  %2063 = vmatprep.mubr.bf16.mxu1 %v2644_v2  ;;  %v1783_v41 = vpop.permute.xlu1 %1782 }
 0x123   : > { %v2254_v34 = vpop.permute.xlu1 %2253 }
 0x128   : > { %2411 = vmatmul.mubr.msk.bf16.vlgmr.msra.gmra.mrb[4].mxu0 %vm378_vm9, %v2409_v11  ;;  %2439 = vmatmul.mubr.msk.bf16.vlgmr.msra.gmra.mrb[4].mxu1 %vm378_vm9, %v2437_v12 }
 0x129   : > { %1638 = vmatpush1.bf16.msra.mxu0 %v2910_v43  ;;  %2080 = vmatpush1.bf16.msra.mxu1 %v2910_v43 }
 0x12a   : > { %2416 = vmatprep.subr.msk.bf16.mxu0 %vm382_vm8, %v2915_v44  ;;  %2444 = vmatprep.subr.msk.bf16.mxu1 %vm382_vm8, %v2915_v44 }
 0x12b   : > { %1669 = vmatprep.mubr.bf16.mxu0 %v2644_v2  ;;  %2111 = vmatprep.mubr.bf16.mxu1 %v2644_v2 }
 0x134   : > { %2414 = vmatmul.mubr.msk.bf16.vlgmr.msra.gmra.mrb[4].mxu0 %vm378_vm9, %v2412_v13  ;;  %2442 = vmatmul.mubr.msk.bf16.vlgmr.msra.gmra.mrb[4].mxu1 %vm378_vm9, %v2440_v17 }
 0x135   : > { %1686 = vmatpush1.bf16.msra.mxu0 %v2935_v56  ;;  %2128 = vmatpush1.bf16.msra.mxu1 %v2935_v56 }
 0x136   : > { %2419 = vmatprep.subr.msk.bf16.mxu0 %vm382_vm8, %v2937_v57  ;;  %2447 = vmatprep.subr.msk.bf16.mxu1 %vm382_vm8, %v2937_v57 }
 0x137   : > { %1717 = vmatprep.mubr.bf16.mxu0 %v2644_v2  ;;  %2159 = vmatprep.mubr.bf16.mxu1 %v2644_v2 }
 0x140   : > { %2417 = vmatmul.mubr.msk.bf16.vlgmr.msra.gmra.mrb[4].mxu0 %vm378_vm9, %v2415_v18  ;;  %2445 = vmatmul.mubr.msk.bf16.vlgmr.msra.gmra.mrb[4].mxu1 %vm378_vm9, %v2443_v19 }
 0x141   : > { %1734 = vmatpush1.bf16.msra.mxu0 %v2964_v3  ;;  %2176 = vmatpush1.bf16.msra.mxu1 %v2964_v3 }
 0x142   : > { %1765 = vmatprep.mubr.bf16.mxu0 %v2644_v2  ;;  %2207 = vmatprep.mubr.bf16.mxu1 %v2644_v2 }
 0x14c   : > { %2420 = vmatmul.mubr.msk.bf16.vlgmr.msra.gmra.mrb[4].mxu0 %vm378_vm9, %v2418_v21  ;;  %2448 = vmatmul.mubr.msk.bf16.vlgmr.msra.gmra.mrb[4].mxu1 %vm378_vm9, %v2446_v22 }
 0x1b7   : > { %v885_v26 = vpop.f32.mrb[0].mxu0  ;;  %v1325_v27 = vpop.f32.mrb[0].mxu1 }
 0x1b8   : > { %v2452_v28 = vadd.f32 %v885_v26, %v374_v24  ;;  %v2454_v29 = vadd.f32 %v1325_v27, %v899_v25  ;;  %v887_v30 = vpop.f32.mrb[1].mxu0  ;;  %v1327_v2 = vpop.f32.mrb[1].mxu1 }
 0x1b9   : > { %v2453_v32 = vadd.f32 %v887_v30, %v374_v24  ;;  %v2455_v33 = vadd.f32 %v1327_v2, %v899_v25  ;;  %v889_v7 = vpop.f32.mrb[2].mxu0  ;;  %v1329_v35 = vpop.f32.mrb[2].mxu1 }
 0x1ba   : > { %v1334_v36 = vmax.f32 %v2452_v28, %v2454_v29  ;;  %v890_v37 = vpop.f32.mrb[3].mxu0  ;;  %v1330_v38 = vpop.f32.mrb[3].mxu1 }
 0x1bb   : > { %v1335_v39 = vmax.f32 %v2453_v32, %v2455_v33 }
 0x21f   : > { %v1767_v42 = vpop.f32.mrb[4].mxu0  ;;  %v2209_v43 = vpop.f32.mrb[4].mxu1 }
 0x220   : > { %v2456_v8 = vadd.f32 %v1767_v42, %v1341_v40  ;;  %v1769_v44 = vpop.f32.mrb[5].mxu0  ;;  %v2211_v45 = vpop.f32.mrb[5].mxu1  ;;  %v2458_v52 = vadd.f32 %v2209_v43, %v1783_v41 }
 0x221   : > { %v2457_v48 = vadd.f32 %v1769_v44, %v1341_v40  ;;  %v1771_v49 = vpop.f32.mrb[6].mxu0  ;;  %v2213_v50 = vpop.f32.mrb[6].mxu1  ;;  %v2459_v57 = vadd.f32 %v2211_v45, %v1783_v41 }
 0x222   : > { %v1776_v51 = vmax.f32 %v1334_v36, %v2456_v8  ;;  %v1772_v53 = vpop.f32.mrb[7].mxu0  ;;  %v2214_v55 = vpop.f32.mrb[7].mxu1 }
 0x223   : > { %v1777_v56 = vmax.f32 %v1335_v39, %v2457_v48 }
 0x224   : > { %v2218_v58 = vmax.f32 %v1776_v51, %v2458_v52 }
 0x225   : > { %v2219_v16 = vmax.f32 %v1777_v56, %v2459_v57 }
 0x226   : > { %v2221_v59 = vsel %vm2220_vm4, %v2218_v58, 0.0 }
 0x227   : > { %v2222_v61 = vsel %vm2220_vm4, %v2219_v16, 0.0 }
 0x228   : > { %v2223_v63 = vadd.f32 %v2222_v61, %v2221_v59 }
 0x22a   : > { %2224 = vadd.xlane.f32.xlu0 %v2223_v63 }
 0x240   : > { %2245 = vperm.xlu0 %2632, %v2242_v0  }
 0x244   : > { %2258 = vrot.lane.b32.xlu0 %v2714_v9, %s2648_s12 }
 0x248   : > { %2262 = vrot.lane.b32.xlu0 %v2716_v10, %s2648_s12 }
 0x2b7   : > { %v2225_v1 = vpop.xlane.xlu0 %2224 }
 0x2b8   : > { %v2227_v3 = vmul.f32 0.00390625, %v2225_v1 }
 0x2ba   : > { %v2228_v15 = vsub.f32 %v2218_v58, %v2227_v3  ;;  %v2229_v4 = vsub.f32 %v2219_v16, %v2227_v3 }
 0x2bc   : > { %v2230_v5 = vmul.f32 %v2228_v15, %v2228_v15  ;;  %v2231_v20 = vmul.f32 %v2229_v4, %v2229_v4 }
 0x2be   : > { %v2232_v6 = vsel %vm2220_vm4, %v2230_v5, 0.0  ;;  %v2233_v23 = vsel %vm2220_vm4, %v2231_v20, 0.0 }
 0x2bf   : > { %v2234_v31 = vadd.f32 %v2233_v23, %v2232_v6  ;;  %v2246_v47 = vpop.permute.xlu0 %2245 }
 0x2c1   : > { %2235 = vadd.xlane.f32.xlu1 %v2234_v31 }
 0x2c3   : > { %v2259_v54 = vpop.permute.xlu0 %2258 }
 0x2c7   : > { %v2263_v12 = vpop.permute.xlu0 %2262 }
 0x2d2   : > { %2260 = vrot.lane.b32.xlu1 %v2725_v14, %s2648_s12 }
 0x34e   : > { %v2236_v9 = vpop.xlane.xlu1 %2235 }
 0x34f   : > { %v2237_v46 = vmul.f32 0.00390625, %v2236_v9 }
 0x351   : > { %v2238_v10 = vadd.f32 1e-05, %v2237_v46 }
 0x352   : > { %v2261_v13 = vpop.permute.xlu1 %2260 }
 0x353   : > { %2634 = vrsqrt.f32 %v2238_v10  ;;  %v2266_v19 = vsel %vm614_vm15, %v2261_v13, %v2263_v12  ;;  %v2265_v22 = vsel %vm614_vm15, %v2259_v54, %v2261_v13 }
 0x35d   : > { %v2635_v60 = vpop.eup %2634 }
 0x35e   : > { %v2240_v62 = vmul.f32 %v2635_v60, %v2228_v15  ;;  %v2241_v11 = vmul.f32 %v2635_v60, %v2229_v4 }
 0x360   : > { %v2248_v17 = vmul.f32 %v2246_v47, %v2240_v62  ;;  %v2249_v18 = vmul.f32 %v2246_v47, %v2241_v11 }
 0x362   : > { %v2256_v21 = vadd.f32 %v2254_v34, %v2248_v17  ;;  %v2257_v14 = vadd.f32 %v2254_v34, %v2249_v18 }
 0x364   : > { %v2269_v24 = vadd.f32 %v2265_v22, %v2256_v21  ;;  %v2270_v25 = vadd.f32 %v2266_v19, %v2257_v14 }
 0x366   : > { %v2273_v26 = vcombine.low %v2269_v24, %v2270_v25 }
 0x368   : > { %2275 = vst [vmem:[%s251_s15] sm:$0xff] %v2273_v26 }
 0x369 PF: > { %s16_s21 = sadd.s32 1, %s2642_s21  }
 0x36a   : > { %p13_p4 = scmp.ge.s32.totalorder %s16_s21, 4  }
 0x36c   :  { %15 = sbr.rel (!%p13_p4) target bundleno = 1 (0x1), region = 112 }

</bundles_post_ra>
